<compile_context>
chip_gen: v6e
topology: v6e:2x2x1
jax: 0.10.0
libtpu: 0.0.40
codegen_flags: <defaults>
</compile_context>

<pallas_src>
import functools

import jax
import jax.numpy as jnp
from jax.experimental import pallas as pl
from jax.experimental.pallas import tpu as pltpu

_EPS = 1e-5
_KW = 4    # kernel size
_PAD = 1   # padding
_VMEM_BUDGET = 24 * 1024 * 1024   # target for the double-buffered working set
_VMEM_LIMIT = 32 * 1024 * 1024    # scoped VMEM limit (safe on v5e/v6e/v7x)


def _round_up(x, m):
    return ((x + m - 1) // m) * m


def _mosaic_params():
    return pltpu.CompilerParams(
        dimension_semantics=("parallel", "parallel"),
        vmem_limit_bytes=_VMEM_LIMIT)


# ----------------------------- Pallas kernels ------------------------------

def _conv_stats_kernel(p_ref, w_ref, b_ref, y_ref, stats_ref, *, relu, m_valid, tm):
    """Matmul (bf16 in, f32 acc) + bias (+ReLU) + per-channel sum / sum-of-squares.

    Grid = (G, num_m); the full K extent is one block (weight resident in VMEM).
      p_ref:     (tm, Kp) bf16   patch tile
      w_ref:     (Kp, Cp) bf16   full weight (same block every grid step)
      b_ref:     (1,  Cp) f32    bias (zeros when the conv has no bias)
      y_ref:     (tm, Cp) bf16   conv(+bias,+relu) output tile (pre-norm)
      stats_ref: (8,  Cp) f32    row 0 = sum, row 1 = sum of squares (rows 2..7 unused)
    """
    y = jnp.dot(p_ref[...], w_ref[...], preferred_element_type=jnp.float32)
    y = y + b_ref[...]
    if relu:
        y = jnp.maximum(y, 0.0)
    yo = y.astype(y_ref.dtype)
    y_ref[...] = yo

    # Stats are taken from the stored (rounded) values so normalization is consistent.
    ys = yo.astype(jnp.float32)
    if m_valid is not None:
        # Pad rows can be nonzero only when the conv has a bias; mask them out.
        # NOTE: pl.program_id is used at the kernel top level only (interpret-safe).
        mi = pl.program_id(1)
        rows = jax.lax.broadcasted_iota(jnp.int32, ys.shape, 0) + mi * tm
        ys = jnp.where(rows < m_valid, ys, 0.0)
    # One-pass E[x^2]-E[x]^2 in f32; acceptable for these magnitudes (see review note).
    stats_ref[0:1, :] = jnp.sum(ys, axis=0, keepdims=True)
    stats_ref[1:2, :] = jnp.sum(ys * ys, axis=0, keepdims=True)


def _conv_plain_kernel(p_ref, w_ref, b_ref, y_ref, *, relu):
    """Matmul + bias (+ReLU), no statistics."""
    y = jnp.dot(p_ref[...], w_ref[...], preferred_element_type=jnp.float32)
    y = y + b_ref[...]
    if relu:
        y = jnp.maximum(y, 0.0)
    y_ref[...] = y.astype(y_ref.dtype)


def _norm_kernel(y_ref, sc_ref, sh_ref, o_ref):
    """y * scale + shift (used only for the returned `squeezed` tensor)."""
    o_ref[...] = (y_ref[...].astype(jnp.float32) * sc_ref[...]
                  + sh_ref[...]).astype(o_ref.dtype)


# ------------------------------- JAX glue ----------------------------------

def _im2col(x, stride):
    """x: (N,H,W,C) NHWC -> bf16 patches (N, Ho*Wo, kh*kw*C), taps ordered (kh,kw,cin).

    Materialized by XLA (bf16) and streamed tile-by-tile through the Pallas kernels.
    """
    n, h, w, c = x.shape
    x = x.astype(jnp.bfloat16)
    xp = jnp.pad(x, ((0, 0), (_PAD, _PAD), (_PAD, _PAD), (0, 0)))
    ho = (h + 2 * _PAD - _KW) // stride + 1
    wo = (w + 2 * _PAD - _KW) // stride + 1
    cols = []
    for kh in range(_KW):
        for kw in range(_KW):
            cols.append(xp[:, kh:kh + stride * (ho - 1) + 1:stride,
                           kw:kw + stride * (wo - 1) + 1:stride, :])
    pat = jnp.stack(cols, axis=3)                 # (N, Ho, Wo, 16, C)
    return pat.reshape(n, ho * wo, _KW * _KW * c), ho, wo


def _pick_tm(m, g, kp, cp, out_itemsize):
    """Largest M tile whose double-buffered working set fits the VMEM budget."""
    wbytes = 2 * kp * cp * 2                       # resident weight (double-buffered)
    tm = 8
    for cand in (1024, 512, 256, 128, 64, 32, 16, 8):
        need = (wbytes + 2 * cand * kp * 2 + 2 * cand * cp * out_itemsize
                + 2 * 8 * cp * 4)
        if need <= _VMEM_BUDGET:
            tm = cand
            break
    tm = max(8, min(tm, _round_up(m, 8)))
    # With G == 1 keep >= 2 M tiles so both TensorCores get work (v7x megacore).
    if g == 1 and m > 8 and _round_up(m, tm) // tm < 2:
        tm = _round_up(-(-m // 2), 8)
    return tm


def _conv_matmul(patches, w, b, *, relu, want_stats, has_bias,
                 out_dtype=jnp.bfloat16):
    """patches (G, M, K); w (K, Cout) f32; b (Cout,) f32.

    Returns:
      y     (G, Mp, Cp) out_dtype : conv + bias (+ReLU), M/K/C zero-padded
      stats (G, num_m, 8, Cp) f32 or None : per-M-tile channel sum / sum-of-squares
      meta  dict(cp, tm, mp)
    """
    g, m, k = patches.shape
    cout = w.shape[1]
    cp = _round_up(cout, 128)                      # lane-dense output channels
    kp = _round_up(k, 128)
    out_itemsize = jnp.dtype(out_dtype).itemsize
    tm = _pick_tm(m, g, kp, cp, out_itemsize)
    mp = _round_up(m, tm)
    num_m = mp // tm

    pat = jnp.pad(patches.astype(jnp.bfloat16), ((0, 0), (0, mp - m), (0, kp - k)))
    wp = jnp.pad(w, ((0, kp - k), (0, cp - cout))).astype(jnp.bfloat16)
    bp = jnp.pad(b.astype(jnp.float32).reshape(1, -1), ((0, 0), (0, cp - cout)))

    # Pad rows only pollute statistics when the conv has a bias (otherwise they are 0).
    m_valid = m if (want_stats and has_bias and (m % tm)) else None

    cost = pl.CostEstimate(
        flops=2 * g * mp * kp * cp,
        transcendentals=0,
        bytes_accessed=int(pat.size * 2 + wp.size * 2
                           + g * mp * cp * out_itemsize))

    in_specs = [pl.BlockSpec((None, tm, kp), lambda gi, mi: (gi, mi, 0)),
                pl.BlockSpec((kp, cp), lambda gi, mi: (0, 0)),
                pl.BlockSpec((1, cp), lambda gi, mi: (0, 0))]

    if want_stats:
        kern = functools.partial(_conv_stats_kernel, relu=relu,
                                 m_valid=m_valid, tm=tm)
        y, stats = pl.pallas_call(
            kern,
            grid=(g, num_m),
            in_specs=in_specs,
            out_specs=[pl.BlockSpec((None, tm, cp), lambda gi, mi: (gi, mi, 0)),
                       pl.BlockSpec((None, 8, cp), lambda gi, mi: (gi, mi, 0))],
            out_shape=[jax.ShapeDtypeStruct((g, mp, cp), out_dtype),
                       jax.ShapeDtypeStruct((g, num_m * 8, cp), jnp.float32)],
            compiler_params=_mosaic_params(),
            cost_estimate=cost,
        )(pat, wp, bp)
        return y, stats.reshape(g, num_m, 8, cp), dict(cp=cp, tm=tm, mp=mp)

    kern = functools.partial(_conv_plain_kernel, relu=relu)
    y = pl.pallas_call(
        kern,
        grid=(g, num_m),
        in_specs=in_specs,
        out_specs=pl.BlockSpec((None, tm, cp), lambda gi, mi: (gi, mi, 0)),
        out_shape=jax.ShapeDtypeStruct((g, mp, cp), out_dtype),
        compiler_params=_mosaic_params(),
        cost_estimate=cost,
    )(pat, wp, bp)
    return y, None, dict(cp=cp, tm=tm, mp=mp)


def _normalize(y, scale, shift, *, tm, out_dtype=jnp.float32):
    """y (G, Mp, Cp) bf16; scale/shift (G, 1, Cp) f32 -> y*scale+shift (Pallas)."""
    g, mp, cp = y.shape
    num_m = mp // tm
    cost = pl.CostEstimate(flops=2 * g * mp * cp, transcendentals=0,
                           bytes_accessed=int(y.size * 2 + g * mp * cp * 4))
    return pl.pallas_call(
        _norm_kernel,
        grid=(g, num_m),
        in_specs=[pl.BlockSpec((None, tm, cp), lambda gi, mi: (gi, mi, 0)),
                  pl.BlockSpec((None, 1, cp), lambda gi, mi: (gi, 0, 0)),
                  pl.BlockSpec((None, 1, cp), lambda gi, mi: (gi, 0, 0))],
        out_specs=pl.BlockSpec((None, tm, cp), lambda gi, mi: (gi, mi, 0)),
        out_shape=jax.ShapeDtypeStruct((g, mp, cp), out_dtype),
        compiler_params=_mosaic_params(),
        cost_estimate=cost,
    )(y, scale, shift)


def _squeeze_forward(x_nhwc, w, b):
    """Conv(s=2, bias) -> ReLU -> InstanceNorm2d (per-sample stats, no affine)."""
    n = x_nhwc.shape[0]
    cout = w.shape[1]
    pat, ho, wo = _im2col(x_nhwc, stride=2)          # (N, Ho*Wo, K); G = N
    m = ho * wo
    y, stats, meta = _conv_matmul(pat, w, b, relu=True, want_stats=True,
                                  has_bias=True)
    s = jnp.sum(stats[:, :, 0, :], axis=1)            # (N, Cp)
    ss = jnp.sum(stats[:, :, 1, :], axis=1)
    mean = s / m
    var = jnp.maximum(ss / m - mean * mean, 0.0)       # biased variance
    scale = jax.lax.rsqrt(var + _EPS)                  # no affine
    shift = -mean * scale
    out = _normalize(y, scale[:, None, :], shift[:, None, :], tm=meta["tm"])
    return out[:, :m, :cout].reshape(n, ho, wo, cout)  # f32 NHWC (returned tensor)


def _bn_conv_layer(x_nhwc, w, stride):
    """Conv(no bias); returns un-normalized bf16 NHWC output + batch mean/var.

    BatchNorm2d training-mode statistics are over (N, H, W) -> G = 1.
    The normalize + LeakyReLU is folded (in XLA) into the next conv's im2col.
    """
    n = x_nhwc.shape[0]
    cout = w.shape[1]
    pat, ho, wo = _im2col(x_nhwc, stride=stride)
    m = n * ho * wo
    pat = pat.reshape(1, m, pat.shape[-1])
    y, stats, meta = _conv_matmul(pat, w, jnp.zeros((cout,), jnp.float32),
                                  relu=False, want_stats=True, has_bias=False)
    s = jnp.sum(stats[:, :, 0, :], axis=1)[0]          # (Cp,)
    ss = jnp.sum(stats[:, :, 1, :], axis=1)[0]
    mean = s / m
    var = jnp.maximum(ss / m - mean * mean, 0.0)        # biased variance
    y_nhwc = y[0, :m, :cout].reshape(n, ho, wo, cout)   # bf16
    return y_nhwc, mean[:cout], var[:cout]


def _norm_lrelu(y_nhwc, scale, shift, slope=0.2):
    """BatchNorm affine + LeakyReLU, fused by XLA into the next conv's im2col."""
    a = y_nhwc.astype(jnp.float32) * scale + shift
    return jnp.where(a >= 0.0, a, slope * a)


def _final_conv(x_nhwc, w, b):
    """Final Conv2d(cin -> 1, k=4, s=1, p=1, bias).

    Decomposed into 16 per-tap 1x1 convs (one Pallas matmul, Cout=16 padded to 128)
    followed by a shifted-sum epilogue in XLA — no 16x im2col tensor for this layer.
    """
    n, h, wd, cin = x_nhwc.shape
    # w: (16*cin, 1), taps ordered (kh, kw, cin) -> per-tap columns (cin, 16)
    w_taps = jnp.transpose(w.reshape(_KW * _KW, cin), (1, 0))
    x_flat = x_nhwc.reshape(1, n * h * wd, cin)
    y, _stats, _meta = _conv_matmul(x_flat, w_taps,
                                    jnp.zeros((_KW * _KW,), jnp.float32),
                                    relu=False, want_stats=False, has_bias=False,
                                    out_dtype=jnp.float32)
    taps = y[0, :n * h * wd, :_KW * _KW].reshape(n, h, wd, _KW * _KW)
    tp = jnp.pad(taps, ((0, 0), (1, 1), (1, 1), (0, 0)))
    ho, wo = h - 1, wd - 1
    acc = jnp.zeros((n, ho, wo), jnp.float32)
    for kh in range(_KW):
        for kw in range(_KW):
            acc = acc + tp[:, kh:kh + ho, kw:kw + wo, kh * _KW + kw]
    return (acc + b[0])[..., None]                     # (N, Ho, Wo, 1) f32


def _forward(params, x_nchw, *, strides):
    x = jnp.transpose(x_nchw, (0, 2, 3, 1)).astype(jnp.float32)   # NCHW -> NHWC
    squeezed = _squeeze_forward(x, params["sq_w"], params["sq_b"])  # f32 NHWC
    h = squeezed
    for lyr, stride in zip(params["layers"], strides):
        y, mean, var = _bn_conv_layer(h, lyr["w"], stride)
        scale = lyr["gamma"] * jax.lax.rsqrt(var + _EPS)
        shift = lyr["beta"] - mean * scale
        h = _norm_lrelu(y, scale, shift)     # fused into the next conv's im2col
    out = _final_conv(h, params["final_w"], params["final_b"])
    # TODO(synk): BatchNorm running-stats side-effect of training-mode forward is not
    # modeled (it does not affect the returned tensors).
    return (jnp.transpose(out, (0, 3, 1, 2)),          # NHWC -> NCHW
            jnp.transpose(squeezed, (0, 3, 1, 2)))


# --------------------------- Module-equivalent ------------------------------

class NLayerDiscriminatorPallas:
    """Pallas port of NLayerDiscriminator(input_nc, ndf, n_layers=3, BatchNorm2d)."""

    def __init__(self, input_nc, ndf=64, n_layers=3, key=None):
        key = jax.random.PRNGKey(0) if key is None else key
        keys = iter(jax.random.split(key, 4 * (n_layers + 3)))

        def conv_w(cin, cout):
            # Stored as (kh*kw*cin, cout), taps ordered (kh, kw, cin).  To load trained
            # PyTorch weights (cout, cin, kh, kw): permute to (kh, kw, cin, cout) then
            # reshape — a plain reshape/transpose is WRONG.
            return 0.02 * jax.random.normal(next(keys), (_KW * _KW * cin, cout),
                                            jnp.float32)

        params = {}
        # squeeze branch (with_statistics=True -> no leading InstanceNorm)
        params["sq_w"] = conv_w(input_nc, ndf)
        params["sq_b"] = 0.02 * jax.random.normal(next(keys), (ndf,), jnp.float32)

        # model branch (use_bias=False because norm is BatchNorm2d; alternate=0)
        layers, strides = [], []
        nf_mult = 1
        for n in range(1, n_layers):
            nf_prev, nf_mult = nf_mult, min(2 ** n, 8)
            cin, cout = ndf * nf_prev, ndf * nf_mult
            layers.append(dict(
                w=conv_w(cin, cout),
                gamma=1.0 + 0.02 * jax.random.normal(next(keys), (cout,), jnp.float32),
                beta=jnp.zeros((cout,), jnp.float32)))
            strides.append(2)
        nf_prev, nf_mult = nf_mult, min(2 ** n_layers, 8)
        cin, cout = ndf * nf_prev, ndf * nf_mult
        layers.append(dict(
            w=conv_w(cin, cout),
            gamma=1.0 + 0.02 * jax.random.normal(next(keys), (cout,), jnp.float32),
            beta=jnp.zeros((cout,), jnp.float32)))
        strides.append(1)
        params["layers"] = layers
        params["final_w"] = conv_w(ndf * nf_mult, 1)
        params["final_b"] = jnp.zeros((1,), jnp.float32)

        self.params = params
        self._fwd = jax.jit(functools.partial(_forward, strides=tuple(strides)))

    def __call__(self, x_nchw):
        return self._fwd(self.params, x_nchw)


# --------------------------------- main -------------------------------------

if __name__ == "__main__":
    # 32x32 spatial is the smallest size keeping every conv's output non-empty for
    # n_layers=3 (32 -> 16 -> 8 -> 4 -> 3 -> 2).
    N, C, H, W = 2, 4, 32, 32
    x = jax.random.normal(jax.random.PRNGKey(0), (N, C, H, W), jnp.float32)

    disc = NLayerDiscriminatorPallas(input_nc=C, ndf=16, n_layers=3,
                                     key=jax.random.PRNGKey(1))
    model_out, squeezed = disc(x)
    jax.block_until_ready((model_out, squeezed))

    assert model_out.shape == (N, 1, 2, 2), model_out.shape
    assert squeezed.shape == (N, 16, 16, 16), squeezed.shape
    assert bool(jnp.all(jnp.isfinite(model_out)))
    assert bool(jnp.all(jnp.isfinite(squeezed)))
    print("KERNEL_OK")
</pallas_src>

<mosaic_0001>
module attributes {stable_mosaic.version = 11 : i64} {
  func.func @_conv_stats_kernel(%arg0: i32, %arg1: i32, %arg2: memref<1x256x128xbf16, #tpu.memory_space<vmem>>, %arg3: memref<128x128xbf16, #tpu.memory_space<vmem>>, %arg4: memref<1x128xf32, #tpu.memory_space<vmem>>, %arg5: memref<1x256x128xbf16, #tpu.memory_space<vmem>>, %arg6: memref<1x8x128xf32, #tpu.memory_space<vmem>>) attributes {dimension_semantics = [#tpu.dimension_semantics<parallel>, #tpu.dimension_semantics<parallel>], iteration_bounds = array<i64: 2, 1>, scalar_prefetch = 0 : i64, scratch_operands = 0 : i64, tpu.core_type = #tpu.core_type<tc>, window_params = [{transform_indices = @transform_0, window_bounds = array<i64: 1, 256, 128>}, {pipeline_mode = #tpu.pipeline_mode<synchronous>, transform_indices = @transform_1, window_bounds = array<i64: 128, 128>}, {pipeline_mode = #tpu.pipeline_mode<synchronous>, transform_indices = @transform_2, window_bounds = array<i64: 1, 128>}, {transform_indices = @transform_3, window_bounds = array<i64: 1, 256, 128>}, {transform_indices = @transform_4, window_bounds = array<i64: 1, 8, 128>}]} {
    %c0 = arith.constant 0 : index
    %c0_0 = arith.constant 0 : index
    %c0_1 = arith.constant 0 : index
    %0 = vector.load %arg2[%c0, %c0_0, %c0_1] : memref<1x256x128xbf16, #tpu.memory_space<vmem>>, vector<1x256x128xbf16>
    %1 = vector.shape_cast %0 : vector<1x256x128xbf16> to vector<256x128xbf16>
    %c0_2 = arith.constant 0 : index
    %c0_3 = arith.constant 0 : index
    %2 = vector.load %arg3[%c0_2, %c0_3] : memref<128x128xbf16, #tpu.memory_space<vmem>>, vector<128x128xbf16>
    %cst = arith.constant dense<0.000000e+00> : vector<256x128xf32>
    %3 = tpu.matmul %1, %2, %cst {dimension_numbers = #tpu.dot_dimension_numbers<[1], [0], [0], [1], [0, 0, 1, 1], [], []>} : vector<256x128xbf16>, vector<128x128xbf16>, vector<256x128xf32> -> vector<256x128xf32>
    %c0_4 = arith.constant 0 : index
    %c0_5 = arith.constant 0 : index
    %4 = vector.load %arg4[%c0_4, %c0_5] : memref<1x128xf32, #tpu.memory_space<vmem>>, vector<1x128xf32>
    %5 = vector.broadcast %4 : vector<1x128xf32> to vector<256x128xf32>
    %6 = arith.addf %3, %5 : vector<256x128xf32>
    %cst_6 = arith.constant 0.000000e+00 : f32
    %7 = vector.broadcast %cst_6 : f32 to vector<256x128xf32>
    %8 = arith.maximumf %6, %7 : vector<256x128xf32>
    %9 = arith.truncf %8 : vector<256x128xf32> to vector<256x128xbf16>
    %c0_7 = arith.constant 0 : index
    %c0_8 = arith.constant 0 : index
    %c0_9 = arith.constant 0 : index
    %10 = vector.load %arg5[%c0_7, %c0_8, %c0_9] : memref<1x256x128xbf16, #tpu.memory_space<vmem>>, vector<1x256x128xbf16>
    %11 = vector.shape_cast %10 : vector<1x256x128xbf16> to vector<256x128xbf16>
    %12 = vector.shape_cast %9 : vector<256x128xbf16> to vector<1x256x128xbf16>
    tpu.vector_store %arg5[%c0_7, %c0_8, %c0_9], %12 {strides = array<i32>} : memref<1x256x128xbf16, #tpu.memory_space<vmem>>, vector<1x256x128xbf16>,
    %13 = arith.extf %9 : vector<256x128xbf16> to vector<256x128xf32>
    %cst_10 = arith.constant dense<0.000000e+00> : vector<128xf32>
    %14 = vector.multi_reduction <add>, %13, %cst_10 [0] : vector<256x128xf32> to vector<128xf32>
    %15 = vector.shape_cast %14 : vector<128xf32> to vector<1x128xf32>
    %c0_11 = arith.constant 0 : index
    %c0_12 = arith.constant 0 : index
    %c0_13 = arith.constant 0 : index
    %16 = vector.load %arg6[%c0_11, %c0_12, %c0_13] : memref<1x8x128xf32, #tpu.memory_space<vmem>>, vector<1x1x128xf32>
    %17 = vector.shape_cast %16 : vector<1x1x128xf32> to vector<1x128xf32>
    %18 = vector.shape_cast %15 : vector<1x128xf32> to vector<1x1x128xf32>
    tpu.vector_store %arg6[%c0_11, %c0_12, %c0_13], %18 {strides = array<i32>} : memref<1x8x128xf32, #tpu.memory_space<vmem>>, vector<1x1x128xf32>,
    %19 = arith.mulf %13, %13 : vector<256x128xf32>
    %cst_14 = arith.constant dense<0.000000e+00> : vector<128xf32>
    %20 = vector.multi_reduction <add>, %19, %cst_14 [0] : vector<256x128xf32> to vector<128xf32>
    %21 = vector.shape_cast %20 : vector<128xf32> to vector<1x128xf32>
    %c0_15 = arith.constant 0 : index
    %c1 = arith.constant 1 : index
    %c0_16 = arith.constant 0 : index
    %22 = vector.load %arg6[%c0_15, %c1, %c0_16] : memref<1x8x128xf32, #tpu.memory_space<vmem>>, vector<1x1x128xf32>
    %23 = vector.shape_cast %22 : vector<1x1x128xf32> to vector<1x128xf32>
    %24 = vector.shape_cast %21 : vector<1x128xf32> to vector<1x1x128xf32>
    tpu.vector_store %arg6[%c0_15, %c1, %c0_16], %24 {strides = array<i32>} : memref<1x8x128xf32, #tpu.memory_space<vmem>>, vector<1x1x128xf32>,
    return
  }
  func.func @transform_0(%arg0: i32, %arg1: i32) -> (i32, i32, i32) {
    %c0_i32 = arith.constant 0 : i32
    %c0_i32_0 = arith.constant 0 : i32
    return %arg0, %arg1, %c0_i32 : i32, i32, i32
  }
  func.func @transform_1(%arg0: i32, %arg1: i32) -> (i32, i32) {
    %c0_i32 = arith.constant 0 : i32
    %c0_i32_0 = arith.constant 0 : i32
    %c0_i32_1 = arith.constant 0 : i32
    return %c0_i32, %c0_i32_0 : i32, i32
  }
  func.func @transform_2(%arg0: i32, %arg1: i32) -> (i32, i32) {
    %c0_i32 = arith.constant 0 : i32
    %c0_i32_0 = arith.constant 0 : i32
    %c0_i32_1 = arith.constant 0 : i32
    return %c0_i32, %c0_i32_0 : i32, i32
  }
  func.func @transform_3(%arg0: i32, %arg1: i32) -> (i32, i32, i32) {
    %c0_i32 = arith.constant 0 : i32
    %c0_i32_0 = arith.constant 0 : i32
    return %arg0, %arg1, %c0_i32 : i32, i32, i32
  }
  func.func @transform_4(%arg0: i32, %arg1: i32) -> (i32, i32, i32) {
    %c0_i32 = arith.constant 0 : i32
    %c0_i32_0 = arith.constant 0 : i32
    return %arg0, %arg1, %c0_i32 : i32, i32, i32
  }
}

module attributes {stable_mosaic.version = 11 : i64} {
  func.func @_norm_kernel(%arg0: i32, %arg1: i32, %arg2: memref<1x256x128xbf16, #tpu.memory_space<vmem>>, %arg3: memref<1x1x128xf32, #tpu.memory_space<vmem>>, %arg4: memref<1x1x128xf32, #tpu.memory_space<vmem>>, %arg5: memref<1x256x128xf32, #tpu.memory_space<vmem>>) attributes {dimension_semantics = [#tpu.dimension_semantics<parallel>, #tpu.dimension_semantics<parallel>], iteration_bounds = array<i64: 2, 1>, scalar_prefetch = 0 : i64, scratch_operands = 0 : i64, tpu.core_type = #tpu.core_type<tc>, window_params = [{transform_indices = @transform_0, window_bounds = array<i64: 1, 256, 128>}, {transform_indices = @transform_1, window_bounds = array<i64: 1, 1, 128>}, {transform_indices = @transform_2, window_bounds = array<i64: 1, 1, 128>}, {transform_indices = @transform_3, window_bounds = array<i64: 1, 256, 128>}]} {
    %c0 = arith.constant 0 : index
    %c0_0 = arith.constant 0 : index
    %c0_1 = arith.constant 0 : index
    %0 = vector.load %arg2[%c0, %c0_0, %c0_1] : memref<1x256x128xbf16, #tpu.memory_space<vmem>>, vector<1x256x128xbf16>
    %1 = vector.shape_cast %0 : vector<1x256x128xbf16> to vector<256x128xbf16>
    %2 = arith.extf %1 : vector<256x128xbf16> to vector<256x128xf32>
    %c0_2 = arith.constant 0 : index
    %c0_3 = arith.constant 0 : index
    %c0_4 = arith.constant 0 : index
    %3 = vector.load %arg3[%c0_2, %c0_3, %c0_4] : memref<1x1x128xf32, #tpu.memory_space<vmem>>, vector<1x1x128xf32>
    %4 = vector.shape_cast %3 : vector<1x1x128xf32> to vector<1x128xf32>
    %5 = vector.broadcast %4 : vector<1x128xf32> to vector<256x128xf32>
    %6 = arith.mulf %2, %5 : vector<256x128xf32>
    %c0_5 = arith.constant 0 : index
    %c0_6 = arith.constant 0 : index
    %c0_7 = arith.constant 0 : index
    %7 = vector.load %arg4[%c0_5, %c0_6, %c0_7] : memref<1x1x128xf32, #tpu.memory_space<vmem>>, vector<1x1x128xf32>
    %8 = vector.shape_cast %7 : vector<1x1x128xf32> to vector<1x128xf32>
    %9 = vector.broadcast %8 : vector<1x128xf32> to vector<256x128xf32>
    %10 = arith.addf %6, %9 : vector<256x128xf32>
    %c0_8 = arith.constant 0 : index
    %c0_9 = arith.constant 0 : index
    %c0_10 = arith.constant 0 : index
    %11 = vector.load %arg5[%c0_8, %c0_9, %c0_10] : memref<1x256x128xf32, #tpu.memory_space<vmem>>, vector<1x256x128xf32>
    %12 = vector.shape_cast %11 : vector<1x256x128xf32> to vector<256x128xf32>
    %13 = vector.shape_cast %10 : vector<256x128xf32> to vector<1x256x128xf32>
    tpu.vector_store %arg5[%c0_8, %c0_9, %c0_10], %13 {strides = array<i32>} : memref<1x256x128xf32, #tpu.memory_space<vmem>>, vector<1x256x128xf32>,
    return
  }
  func.func @transform_0(%arg0: i32, %arg1: i32) -> (i32, i32, i32) {
    %c0_i32 = arith.constant 0 : i32
    %c0_i32_0 = arith.constant 0 : i32
    return %arg0, %arg1, %c0_i32 : i32, i32, i32
  }
  func.func @transform_1(%arg0: i32, %arg1: i32) -> (i32, i32, i32) {
    %c0_i32 = arith.constant 0 : i32
    %c0_i32_0 = arith.constant 0 : i32
    %c0_i32_1 = arith.constant 0 : i32
    return %arg0, %c0_i32, %c0_i32_0 : i32, i32, i32
  }
  func.func @transform_2(%arg0: i32, %arg1: i32) -> (i32, i32, i32) {
    %c0_i32 = arith.constant 0 : i32
    %c0_i32_0 = arith.constant 0 : i32
    %c0_i32_1 = arith.constant 0 : i32
    return %arg0, %c0_i32, %c0_i32_0 : i32, i32, i32
  }
  func.func @transform_3(%arg0: i32, %arg1: i32) -> (i32, i32, i32) {
    %c0_i32 = arith.constant 0 : i32
    %c0_i32_0 = arith.constant 0 : i32
    return %arg0, %arg1, %c0_i32 : i32, i32, i32
  }
}

module attributes {stable_mosaic.version = 11 : i64} {
  func.func @_conv_stats_kernel(%arg0: i32, %arg1: i32, %arg2: memref<1x64x256xbf16, #tpu.memory_space<vmem>>, %arg3: memref<256x128xbf16, #tpu.memory_space<vmem>>, %arg4: memref<1x128xf32, #tpu.memory_space<vmem>>, %arg5: memref<1x64x128xbf16, #tpu.memory_space<vmem>>, %arg6: memref<1x8x128xf32, #tpu.memory_space<vmem>>) attributes {dimension_semantics = [#tpu.dimension_semantics<parallel>, #tpu.dimension_semantics<parallel>], iteration_bounds = array<i64: 1, 2>, scalar_prefetch = 0 : i64, scratch_operands = 0 : i64, tpu.core_type = #tpu.core_type<tc>, window_params = [{transform_indices = @transform_0, window_bounds = array<i64: 1, 64, 256>}, {pipeline_mode = #tpu.pipeline_mode<synchronous>, transform_indices = @transform_1, window_bounds = array<i64: 256, 128>}, {pipeline_mode = #tpu.pipeline_mode<synchronous>, transform_indices = @transform_2, window_bounds = array<i64: 1, 128>}, {transform_indices = @transform_3, window_bounds = array<i64: 1, 64, 128>}, {transform_indices = @transform_4, window_bounds = array<i64: 1, 8, 128>}]} {
    %c0 = arith.constant 0 : index
    %c0_0 = arith.constant 0 : index
    %c0_1 = arith.constant 0 : index
    %0 = vector.load %arg2[%c0, %c0_0, %c0_1] : memref<1x64x256xbf16, #tpu.memory_space<vmem>>, vector<1x64x256xbf16>
    %1 = vector.shape_cast %0 : vector<1x64x256xbf16> to vector<64x256xbf16>
    %c0_2 = arith.constant 0 : index
    %c0_3 = arith.constant 0 : index
    %2 = vector.load %arg3[%c0_2, %c0_3] : memref<256x128xbf16, #tpu.memory_space<vmem>>, vector<256x128xbf16>
    %cst = arith.constant dense<0.000000e+00> : vector<64x128xf32>
    %3 = tpu.matmul %1, %2, %cst {dimension_numbers = #tpu.dot_dimension_numbers<[1], [0], [0], [1], [0, 0, 1, 1], [], []>} : vector<64x256xbf16>, vector<256x128xbf16>, vector<64x128xf32> -> vector<64x128xf32>
    %c0_4 = arith.constant 0 : index
    %c0_5 = arith.constant 0 : index
    %4 = vector.load %arg4[%c0_4, %c0_5] : memref<1x128xf32, #tpu.memory_space<vmem>>, vector<1x128xf32>
    %5 = vector.broadcast %4 : vector<1x128xf32> to vector<64x128xf32>
    %6 = arith.addf %3, %5 : vector<64x128xf32>
    %7 = arith.truncf %6 : vector<64x128xf32> to vector<64x128xbf16>
    %c0_6 = arith.constant 0 : index
    %c0_7 = arith.constant 0 : index
    %c0_8 = arith.constant 0 : index
    %8 = vector.load %arg5[%c0_6, %c0_7, %c0_8] : memref<1x64x128xbf16, #tpu.memory_space<vmem>>, vector<1x64x128xbf16>
    %9 = vector.shape_cast %8 : vector<1x64x128xbf16> to vector<64x128xbf16>
    %10 = vector.shape_cast %7 : vector<64x128xbf16> to vector<1x64x128xbf16>
    tpu.vector_store %arg5[%c0_6, %c0_7, %c0_8], %10 {strides = array<i32>} : memref<1x64x128xbf16, #tpu.memory_space<vmem>>, vector<1x64x128xbf16>,
    %11 = arith.extf %7 : vector<64x128xbf16> to vector<64x128xf32>
    %cst_9 = arith.constant dense<0.000000e+00> : vector<128xf32>
    %12 = vector.multi_reduction <add>, %11, %cst_9 [0] : vector<64x128xf32> to vector<128xf32>
    %13 = vector.shape_cast %12 : vector<128xf32> to vector<1x128xf32>
    %c0_10 = arith.constant 0 : index
    %c0_11 = arith.constant 0 : index
    %c0_12 = arith.constant 0 : index
    %14 = vector.load %arg6[%c0_10, %c0_11, %c0_12] : memref<1x8x128xf32, #tpu.memory_space<vmem>>, vector<1x1x128xf32>
    %15 = vector.shape_cast %14 : vector<1x1x128xf32> to vector<1x128xf32>
    %16 = vector.shape_cast %13 : vector<1x128xf32> to vector<1x1x128xf32>
    tpu.vector_store %arg6[%c0_10, %c0_11, %c0_12], %16 {strides = array<i32>} : memref<1x8x128xf32, #tpu.memory_space<vmem>>, vector<1x1x128xf32>,
    %17 = arith.mulf %11, %11 : vector<64x128xf32>
    %cst_13 = arith.constant dense<0.000000e+00> : vector<128xf32>
    %18 = vector.multi_reduction <add>, %17, %cst_13 [0] : vector<64x128xf32> to vector<128xf32>
    %19 = vector.shape_cast %18 : vector<128xf32> to vector<1x128xf32>
    %c0_14 = arith.constant 0 : index
    %c1 = arith.constant 1 : index
    %c0_15 = arith.constant 0 : index
    %20 = vector.load %arg6[%c0_14, %c1, %c0_15] : memref<1x8x128xf32, #tpu.memory_space<vmem>>, vector<1x1x128xf32>
    %21 = vector.shape_cast %20 : vector<1x1x128xf32> to vector<1x128xf32>
    %22 = vector.shape_cast %19 : vector<1x128xf32> to vector<1x1x128xf32>
    tpu.vector_store %arg6[%c0_14, %c1, %c0_15], %22 {strides = array<i32>} : memref<1x8x128xf32, #tpu.memory_space<vmem>>, vector<1x1x128xf32>,
    return
  }
  func.func @transform_0(%arg0: i32, %arg1: i32) -> (i32, i32, i32) {
    %c0_i32 = arith.constant 0 : i32
    %c0_i32_0 = arith.constant 0 : i32
    return %arg0, %arg1, %c0_i32 : i32, i32, i32
  }
  func.func @transform_1(%arg0: i32, %arg1: i32) -> (i32, i32) {
    %c0_i32 = arith.constant 0 : i32
    %c0_i32_0 = arith.constant 0 : i32
    %c0_i32_1 = arith.constant 0 : i32
    return %c0_i32, %c0_i32_0 : i32, i32
  }
  func.func @transform_2(%arg0: i32, %arg1: i32) -> (i32, i32) {
    %c0_i32 = arith.constant 0 : i32
    %c0_i32_0 = arith.constant 0 : i32
    %c0_i32_1 = arith.constant 0 : i32
    return %c0_i32, %c0_i32_0 : i32, i32
  }
  func.func @transform_3(%arg0: i32, %arg1: i32) -> (i32, i32, i32) {
    %c0_i32 = arith.constant 0 : i32
    %c0_i32_0 = arith.constant 0 : i32
    return %arg0, %arg1, %c0_i32 : i32, i32, i32
  }
  func.func @transform_4(%arg0: i32, %arg1: i32) -> (i32, i32, i32) {
    %c0_i32 = arith.constant 0 : i32
    %c0_i32_0 = arith.constant 0 : i32
    return %arg0, %arg1, %c0_i32 : i32, i32, i32
  }
}

module attributes {stable_mosaic.version = 11 : i64} {
  func.func @_conv_stats_kernel(%arg0: i32, %arg1: i32, %arg2: memref<1x16x512xbf16, #tpu.memory_space<vmem>>, %arg3: memref<512x128xbf16, #tpu.memory_space<vmem>>, %arg4: memref<1x128xf32, #tpu.memory_space<vmem>>, %arg5: memref<1x16x128xbf16, #tpu.memory_space<vmem>>, %arg6: memref<1x8x128xf32, #tpu.memory_space<vmem>>) attributes {dimension_semantics = [#tpu.dimension_semantics<parallel>, #tpu.dimension_semantics<parallel>], iteration_bounds = array<i64: 1, 2>, scalar_prefetch = 0 : i64, scratch_operands = 0 : i64, tpu.core_type = #tpu.core_type<tc>, window_params = [{transform_indices = @transform_0, window_bounds = array<i64: 1, 16, 512>}, {pipeline_mode = #tpu.pipeline_mode<synchronous>, transform_indices = @transform_1, window_bounds = array<i64: 512, 128>}, {pipeline_mode = #tpu.pipeline_mode<synchronous>, transform_indices = @transform_2, window_bounds = array<i64: 1, 128>}, {transform_indices = @transform_3, window_bounds = array<i64: 1, 16, 128>}, {transform_indices = @transform_4, window_bounds = array<i64: 1, 8, 128>}]} {
    %c0 = arith.constant 0 : index
    %c0_0 = arith.constant 0 : index
    %c0_1 = arith.constant 0 : index
    %0 = vector.load %arg2[%c0, %c0_0, %c0_1] : memref<1x16x512xbf16, #tpu.memory_space<vmem>>, vector<1x16x512xbf16>
    %1 = vector.shape_cast %0 : vector<1x16x512xbf16> to vector<16x512xbf16>
    %c0_2 = arith.constant 0 : index
    %c0_3 = arith.constant 0 : index
    %2 = vector.load %arg3[%c0_2, %c0_3] : memref<512x128xbf16, #tpu.memory_space<vmem>>, vector<512x128xbf16>
    %cst = arith.constant dense<0.000000e+00> : vector<16x128xf32>
    %3 = tpu.matmul %1, %2, %cst {dimension_numbers = #tpu.dot_dimension_numbers<[1], [0], [0], [1], [0, 0, 1, 1], [], []>} : vector<16x512xbf16>, vector<512x128xbf16>, vector<16x128xf32> -> vector<16x128xf32>
    %c0_4 = arith.constant 0 : index
    %c0_5 = arith.constant 0 : index
    %4 = vector.load %arg4[%c0_4, %c0_5] : memref<1x128xf32, #tpu.memory_space<vmem>>, vector<1x128xf32>
    %5 = vector.broadcast %4 : vector<1x128xf32> to vector<16x128xf32>
    %6 = arith.addf %3, %5 : vector<16x128xf32>
    %7 = arith.truncf %6 : vector<16x128xf32> to vector<16x128xbf16>
    %c0_6 = arith.constant 0 : index
    %c0_7 = arith.constant 0 : index
    %c0_8 = arith.constant 0 : index
    %8 = vector.load %arg5[%c0_6, %c0_7, %c0_8] : memref<1x16x128xbf16, #tpu.memory_space<vmem>>, vector<1x16x128xbf16>
    %9 = vector.shape_cast %8 : vector<1x16x128xbf16> to vector<16x128xbf16>
    %10 = vector.shape_cast %7 : vector<16x128xbf16> to vector<1x16x128xbf16>
    tpu.vector_store %arg5[%c0_6, %c0_7, %c0_8], %10 {strides = array<i32>} : memref<1x16x128xbf16, #tpu.memory_space<vmem>>, vector<1x16x128xbf16>,
    %11 = arith.extf %7 : vector<16x128xbf16> to vector<16x128xf32>
    %cst_9 = arith.constant dense<0.000000e+00> : vector<128xf32>
    %12 = vector.multi_reduction <add>, %11, %cst_9 [0] : vector<16x128xf32> to vector<128xf32>
    %13 = vector.shape_cast %12 : vector<128xf32> to vector<1x128xf32>
    %c0_10 = arith.constant 0 : index
    %c0_11 = arith.constant 0 : index
    %c0_12 = arith.constant 0 : index
    %14 = vector.load %arg6[%c0_10, %c0_11, %c0_12] : memref<1x8x128xf32, #tpu.memory_space<vmem>>, vector<1x1x128xf32>
    %15 = vector.shape_cast %14 : vector<1x1x128xf32> to vector<1x128xf32>
    %16 = vector.shape_cast %13 : vector<1x128xf32> to vector<1x1x128xf32>
    tpu.vector_store %arg6[%c0_10, %c0_11, %c0_12], %16 {strides = array<i32>} : memref<1x8x128xf32, #tpu.memory_space<vmem>>, vector<1x1x128xf32>,
    %17 = arith.mulf %11, %11 : vector<16x128xf32>
    %cst_13 = arith.constant dense<0.000000e+00> : vector<128xf32>
    %18 = vector.multi_reduction <add>, %17, %cst_13 [0] : vector<16x128xf32> to vector<128xf32>
    %19 = vector.shape_cast %18 : vector<128xf32> to vector<1x128xf32>
    %c0_14 = arith.constant 0 : index
    %c1 = arith.constant 1 : index
    %c0_15 = arith.constant 0 : index
    %20 = vector.load %arg6[%c0_14, %c1, %c0_15] : memref<1x8x128xf32, #tpu.memory_space<vmem>>, vector<1x1x128xf32>
    %21 = vector.shape_cast %20 : vector<1x1x128xf32> to vector<1x128xf32>
    %22 = vector.shape_cast %19 : vector<1x128xf32> to vector<1x1x128xf32>
    tpu.vector_store %arg6[%c0_14, %c1, %c0_15], %22 {strides = array<i32>} : memref<1x8x128xf32, #tpu.memory_space<vmem>>, vector<1x1x128xf32>,
    return
  }
  func.func @transform_0(%arg0: i32, %arg1: i32) -> (i32, i32, i32) {
    %c0_i32 = arith.constant 0 : i32
    %c0_i32_0 = arith.constant 0 : i32
    return %arg0, %arg1, %c0_i32 : i32, i32, i32
  }
  func.func @transform_1(%arg0: i32, %arg1: i32) -> (i32, i32) {
    %c0_i32 = arith.constant 0 : i32
    %c0_i32_0 = arith.constant 0 : i32
    %c0_i32_1 = arith.constant 0 : i32
    return %c0_i32, %c0_i32_0 : i32, i32
  }
  func.func @transform_2(%arg0: i32, %arg1: i32) -> (i32, i32) {
    %c0_i32 = arith.constant 0 : i32
    %c0_i32_0 = arith.constant 0 : i32
    %c0_i32_1 = arith.constant 0 : i32
    return %c0_i32, %c0_i32_0 : i32, i32
  }
  func.func @transform_3(%arg0: i32, %arg1: i32) -> (i32, i32, i32) {
    %c0_i32 = arith.constant 0 : i32
    %c0_i32_0 = arith.constant 0 : i32
    return %arg0, %arg1, %c0_i32 : i32, i32, i32
  }
  func.func @transform_4(%arg0: i32, %arg1: i32) -> (i32, i32, i32) {
    %c0_i32 = arith.constant 0 : i32
    %c0_i32_0 = arith.constant 0 : i32
    return %arg0, %arg1, %c0_i32 : i32, i32, i32
  }
}

module attributes {stable_mosaic.version = 11 : i64} {
  func.func @_conv_stats_kernel(%arg0: i32, %arg1: i32, %arg2: memref<1x16x1024xbf16, #tpu.memory_space<vmem>>, %arg3: memref<1024x128xbf16, #tpu.memory_space<vmem>>, %arg4: memref<1x128xf32, #tpu.memory_space<vmem>>, %arg5: memref<1x16x128xbf16, #tpu.memory_space<vmem>>, %arg6: memref<1x8x128xf32, #tpu.memory_space<vmem>>) attributes {dimension_semantics = [#tpu.dimension_semantics<parallel>, #tpu.dimension_semantics<parallel>], iteration_bounds = array<i64: 1, 2>, scalar_prefetch = 0 : i64, scratch_operands = 0 : i64, tpu.core_type = #tpu.core_type<tc>, window_params = [{transform_indices = @transform_0, window_bounds = array<i64: 1, 16, 1024>}, {pipeline_mode = #tpu.pipeline_mode<synchronous>, transform_indices = @transform_1, window_bounds = array<i64: 1024, 128>}, {pipeline_mode = #tpu.pipeline_mode<synchronous>, transform_indices = @transform_2, window_bounds = array<i64: 1, 128>}, {transform_indices = @transform_3, window_bounds = array<i64: 1, 16, 128>}, {transform_indices = @transform_4, window_bounds = array<i64: 1, 8, 128>}]} {
    %c0 = arith.constant 0 : index
    %c0_0 = arith.constant 0 : index
    %c0_1 = arith.constant 0 : index
    %0 = vector.load %arg2[%c0, %c0_0, %c0_1] : memref<1x16x1024xbf16, #tpu.memory_space<vmem>>, vector<1x16x1024xbf16>
    %1 = vector.shape_cast %0 : vector<1x16x1024xbf16> to vector<16x1024xbf16>
    %c0_2 = arith.constant 0 : index
    %c0_3 = arith.constant 0 : index
    %2 = vector.load %arg3[%c0_2, %c0_3] : memref<1024x128xbf16, #tpu.memory_space<vmem>>, vector<1024x128xbf16>
    %cst = arith.constant dense<0.000000e+00> : vector<16x128xf32>
    %3 = tpu.matmul %1, %2, %cst {dimension_numbers = #tpu.dot_dimension_numbers<[1], [0], [0], [1], [0, 0, 1, 1], [], []>} : vector<16x1024xbf16>, vector<1024x128xbf16>, vector<16x128xf32> -> vector<16x128xf32>
    %c0_4 = arith.constant 0 : index
    %c0_5 = arith.constant 0 : index
    %4 = vector.load %arg4[%c0_4, %c0_5] : memref<1x128xf32, #tpu.memory_space<vmem>>, vector<1x128xf32>
    %5 = vector.broadcast %4 : vector<1x128xf32> to vector<16x128xf32>
    %6 = arith.addf %3, %5 : vector<16x128xf32>
    %7 = arith.truncf %6 : vector<16x128xf32> to vector<16x128xbf16>
    %c0_6 = arith.constant 0 : index
    %c0_7 = arith.constant 0 : index
    %c0_8 = arith.constant 0 : index
    %8 = vector.load %arg5[%c0_6, %c0_7, %c0_8] : memref<1x16x128xbf16, #tpu.memory_space<vmem>>, vector<1x16x128xbf16>
    %9 = vector.shape_cast %8 : vector<1x16x128xbf16> to vector<16x128xbf16>
    %10 = vector.shape_cast %7 : vector<16x128xbf16> to vector<1x16x128xbf16>
    tpu.vector_store %arg5[%c0_6, %c0_7, %c0_8], %10 {strides = array<i32>} : memref<1x16x128xbf16, #tpu.memory_space<vmem>>, vector<1x16x128xbf16>,
    %11 = arith.extf %7 : vector<16x128xbf16> to vector<16x128xf32>
    %cst_9 = arith.constant dense<0.000000e+00> : vector<128xf32>
    %12 = vector.multi_reduction <add>, %11, %cst_9 [0] : vector<16x128xf32> to vector<128xf32>
    %13 = vector.shape_cast %12 : vector<128xf32> to vector<1x128xf32>
    %c0_10 = arith.constant 0 : index
    %c0_11 = arith.constant 0 : index
    %c0_12 = arith.constant 0 : index
    %14 = vector.load %arg6[%c0_10, %c0_11, %c0_12] : memref<1x8x128xf32, #tpu.memory_space<vmem>>, vector<1x1x128xf32>
    %15 = vector.shape_cast %14 : vector<1x1x128xf32> to vector<1x128xf32>
    %16 = vector.shape_cast %13 : vector<1x128xf32> to vector<1x1x128xf32>
    tpu.vector_store %arg6[%c0_10, %c0_11, %c0_12], %16 {strides = array<i32>} : memref<1x8x128xf32, #tpu.memory_space<vmem>>, vector<1x1x128xf32>,
    %17 = arith.mulf %11, %11 : vector<16x128xf32>
    %cst_13 = arith.constant dense<0.000000e+00> : vector<128xf32>
    %18 = vector.multi_reduction <add>, %17, %cst_13 [0] : vector<16x128xf32> to vector<128xf32>
    %19 = vector.shape_cast %18 : vector<128xf32> to vector<1x128xf32>
    %c0_14 = arith.constant 0 : index
    %c1 = arith.constant 1 : index
    %c0_15 = arith.constant 0 : index
    %20 = vector.load %arg6[%c0_14, %c1, %c0_15] : memref<1x8x128xf32, #tpu.memory_space<vmem>>, vector<1x1x128xf32>
    %21 = vector.shape_cast %20 : vector<1x1x128xf32> to vector<1x128xf32>
    %22 = vector.shape_cast %19 : vector<1x128xf32> to vector<1x1x128xf32>
    tpu.vector_store %arg6[%c0_14, %c1, %c0_15], %22 {strides = array<i32>} : memref<1x8x128xf32, #tpu.memory_space<vmem>>, vector<1x1x128xf32>,
    return
  }
  func.func @transform_0(%arg0: i32, %arg1: i32) -> (i32, i32, i32) {
    %c0_i32 = arith.constant 0 : i32
    %c0_i32_0 = arith.constant 0 : i32
    return %arg0, %arg1, %c0_i32 : i32, i32, i32
  }
  func.func @transform_1(%arg0: i32, %arg1: i32) -> (i32, i32) {
    %c0_i32 = arith.constant 0 : i32
    %c0_i32_0 = arith.constant 0 : i32
    %c0_i32_1 = arith.constant 0 : i32
    return %c0_i32, %c0_i32_0 : i32, i32
  }
  func.func @transform_2(%arg0: i32, %arg1: i32) -> (i32, i32) {
    %c0_i32 = arith.constant 0 : i32
    %c0_i32_0 = arith.constant 0 : i32
    %c0_i32_1 = arith.constant 0 : i32
    return %c0_i32, %c0_i32_0 : i32, i32
  }
  func.func @transform_3(%arg0: i32, %arg1: i32) -> (i32, i32, i32) {
    %c0_i32 = arith.constant 0 : i32
    %c0_i32_0 = arith.constant 0 : i32
    return %arg0, %arg1, %c0_i32 : i32, i32, i32
  }
  func.func @transform_4(%arg0: i32, %arg1: i32) -> (i32, i32, i32) {
    %c0_i32 = arith.constant 0 : i32
    %c0_i32_0 = arith.constant 0 : i32
    return %arg0, %arg1, %c0_i32 : i32, i32, i32
  }
}

module attributes {stable_mosaic.version = 11 : i64} {
  func.func @_conv_plain_kernel(%arg0: i32, %arg1: i32, %arg2: memref<1x16x128xbf16, #tpu.memory_space<vmem>>, %arg3: memref<128x128xbf16, #tpu.memory_space<vmem>>, %arg4: memref<1x128xf32, #tpu.memory_space<vmem>>, %arg5: memref<1x16x128xf32, #tpu.memory_space<vmem>>) attributes {dimension_semantics = [#tpu.dimension_semantics<parallel>, #tpu.dimension_semantics<parallel>], iteration_bounds = array<i64: 1, 2>, scalar_prefetch = 0 : i64, scratch_operands = 0 : i64, tpu.core_type = #tpu.core_type<tc>, window_params = [{transform_indices = @transform_0, window_bounds = array<i64: 1, 16, 128>}, {pipeline_mode = #tpu.pipeline_mode<synchronous>, transform_indices = @transform_1, window_bounds = array<i64: 128, 128>}, {pipeline_mode = #tpu.pipeline_mode<synchronous>, transform_indices = @transform_2, window_bounds = array<i64: 1, 128>}, {transform_indices = @transform_3, window_bounds = array<i64: 1, 16, 128>}]} {
    %c0 = arith.constant 0 : index
    %c0_0 = arith.constant 0 : index
    %c0_1 = arith.constant 0 : index
    %0 = vector.load %arg2[%c0, %c0_0, %c0_1] : memref<1x16x128xbf16, #tpu.memory_space<vmem>>, vector<1x16x128xbf16>
    %1 = vector.shape_cast %0 : vector<1x16x128xbf16> to vector<16x128xbf16>
    %c0_2 = arith.constant 0 : index
    %c0_3 = arith.constant 0 : index
    %2 = vector.load %arg3[%c0_2, %c0_3] : memref<128x128xbf16, #tpu.memory_space<vmem>>, vector<128x128xbf16>
    %cst = arith.constant dense<0.000000e+00> : vector<16x128xf32>
    %3 = tpu.matmul %1, %2, %cst {dimension_numbers = #tpu.dot_dimension_numbers<[1], [0], [0], [1], [0, 0, 1, 1], [], []>} : vector<16x128xbf16>, vector<128x128xbf16>, vector<16x128xf32> -> vector<16x128xf32>
    %c0_4 = arith.constant 0 : index
    %c0_5 = arith.constant 0 : index
    %4 = vector.load %arg4[%c0_4, %c0_5] : memref<1x128xf32, #tpu.memory_space<vmem>>, vector<1x128xf32>
    %5 = vector.broadcast %4 : vector<1x128xf32> to vector<16x128xf32>
    %6 = arith.addf %3, %5 : vector<16x128xf32>
    %c0_6 = arith.constant 0 : index
    %c0_7 = arith.constant 0 : index
    %c0_8 = arith.constant 0 : index
    %7 = vector.load %arg5[%c0_6, %c0_7, %c0_8] : memref<1x16x128xf32, #tpu.memory_space<vmem>>, vector<1x16x128xf32>
    %8 = vector.shape_cast %7 : vector<1x16x128xf32> to vector<16x128xf32>
    %9 = vector.shape_cast %6 : vector<16x128xf32> to vector<1x16x128xf32>
    tpu.vector_store %arg5[%c0_6, %c0_7, %c0_8], %9 {strides = array<i32>} : memref<1x16x128xf32, #tpu.memory_space<vmem>>, vector<1x16x128xf32>,
    return
  }
  func.func @transform_0(%arg0: i32, %arg1: i32) -> (i32, i32, i32) {
    %c0_i32 = arith.constant 0 : i32
    %c0_i32_0 = arith.constant 0 : i32
    return %arg0, %arg1, %c0_i32 : i32, i32, i32
  }
  func.func @transform_1(%arg0: i32, %arg1: i32) -> (i32, i32) {
    %c0_i32 = arith.constant 0 : i32
    %c0_i32_0 = arith.constant 0 : i32
    %c0_i32_1 = arith.constant 0 : i32
    return %c0_i32, %c0_i32_0 : i32, i32
  }
  func.func @transform_2(%arg0: i32, %arg1: i32) -> (i32, i32) {
    %c0_i32 = arith.constant 0 : i32
    %c0_i32_0 = arith.constant 0 : i32
    %c0_i32_1 = arith.constant 0 : i32
    return %c0_i32, %c0_i32_0 : i32, i32
  }
  func.func @transform_3(%arg0: i32, %arg1: i32) -> (i32, i32, i32) {
    %c0_i32 = arith.constant 0 : i32
    %c0_i32_0 = arith.constant 0 : i32
    return %arg0, %arg1, %c0_i32 : i32, i32, i32
  }
}

</mosaic_0001>

<bundles_post_ra>
// kernel: mul.21
= control target key start
LH: loop header
LB: loop body
LE: loop exit
PB: predicated region body
PF: predicated region fallthrough
CT: control target
= control target key end

     0   :  { %s56_s0 = inlined_call_operand.vmem [shape: f32[2,1,128], index: 0, kind: input, shape index: {}]   ;;  %s57_s1 = inlined_call_operand.vmem [shape: f32[2,1,128], index: 1, kind: input, shape index: {}]   ;;  %s58_s2 = inlined_call_operand.vmem [shape: f32[2,1,128], index: 2, kind: output, shape index: {}]  }
   0x1   :  { %v3_v0 = vld [vmem:[%s56_s0] sm:$0x1]  ;;  %v20_v2 = vld [vmem:[%s56_s0 + $0x1] sm:$0x1] }
   0x2   :  { %v4_v1 = vld [vmem:[%s57_s1] sm:$0x1]  ;;  %v21_v4 = vld [vmem:[%s57_s1 + $0x1] sm:$0x1] }
   0x3   :  { %v7_v3 = vmul.f32 %v4_v1, %v3_v0  ;;  %v16_v5 = vmul.f32 %v21_v4, %v20_v2 }
   0x5   :  { %9 = vst [vmem:[%s58_s2] sm:$0x1] %v7_v3  ;;  %22 = vst [vmem:[%s58_s2 + $0x1] sm:$0x1] %v16_v5 }

// kernel: _forward.7
= control target key start
LH: loop header
LB: loop body
LE: loop exit
PB: predicated region body
PF: predicated region fallthrough
CT: control target
= control target key end

     0   :  { %s679_s12 = smov 0   ;;  %s681_s13 = smov 0   ;;  %s838_s0 = inlined_call_operand.vmem [shape: bf16[2,256,128], index: 0, kind: input, shape index: {}]   ;;  %s839_s1 = inlined_call_operand.vmem [shape: f32[2,1,128], index: 1, kind: input, shape index: {}]   ;;  %s840_s2 = inlined_call_operand.vmem [shape: f32[2,1,128], index: 2, kind: input, shape index: {}]   ;;  %s841_s3 = inlined_call_operand.vmem [shape: f32[2,256,128], index: 3, kind: output, shape index: {}]  }
   0x1   :  { %s683_s14 = smov 0  }
   0x2 LB: > { %s25_s15 = sadd.s32 1, %s653_s13  ;;  %p521_p0 = scmp.ge.s32.totalorder %s657_s14, 1  ;;  %s657_s14 = sphi %s683_s14, %s13_s14   ;;  %s653_s13 = sphi %s681_s13, %s843_s13   ;;  %s649_s12 = sphi %s679_s12, %s842_s12  }
   0x3   : > { %p27_p1 = scmp.ge.s32.totalorder %s25_s15, 2  ;;  %p174_p2 = scmp.lt.s32.totalorder %s657_s14, 3 }
   0x5   : > { %s845_s15 = smov (%p27_p1, %s25_s15), 0  ;;  %p175_p3 = pnand %p521_p0, %p174_p2 }
   0x6   : > { %p213_p4 = scmp.lt.s32.totalorder (!%p175_p3), %s649_s12, 1 }
   0x7   : > { %178 = sbr.rel (%p175_p3) target bundleno = 44 (0x2c), region = 32 }
   0xc   : > { %s847_s12 = smov (!%p213_p4, %s649_s12), 1 }
   0xd   : > { %s530_s16 = sshll.u32 %s847_s12, 7  ;;  %s224_s19 = scalar_lea.vmem %s839_s1, %s847_s12 }
   0xe   : > { %s703_s22 = scalar_lea.vmem %s838_s0, %s530_s16  ;;  %s227_s25 = scalar_lea.vmem %s840_s2, %s847_s12  ;;  %v709_v1 = vld [vmem:[%s224_s19] ss:$0 sm:$0xff] }
   0xf   : > { %v533_v0 = vld [vmem:[%s703_s22] sm:$0xff]   ;;  %v596_v2 = vld [vmem:[%s703_s22 + $0x8] sm:$0xff]   ;;  %s531_s26 = sshll.u32 %s847_s12, 8  ;;  %v597_v7 = vld [vmem:[%s703_s22 + $0x10] sm:$0xff]  }
  0x10   : > { %v534_v3 = vunpack.c.l.bf16 %v533_v0  ;;  %v535_v4 = vunpack.c.h.bf16 %v533_v0  ;;  %v538_v5 = vunpack.c.l.bf16 %v596_v2  ;;  %v539_v6 = vunpack.c.h.bf16 %v596_v2  ;;  %v598_v8 = vld [vmem:[%s703_s22 + $0x18] sm:$0xff]   ;;  %v714_v9 = vld [vmem:[%s227_s25] ss:$0 sm:$0xff]  ;;  %s723_s29 = scalar_lea.vmem %s841_s3, %s531_s26  ;;  %v600_v23 = vld [vmem:[%s703_s22 + $0x28] sm:$0xff]  }
  0x11   : > { %v542_v10 = vunpack.c.l.bf16 %v597_v7  ;;  %v543_v11 = vunpack.c.h.bf16 %v597_v7  ;;  %v546_v12 = vunpack.c.l.bf16 %v598_v8  ;;  %v547_v13 = vunpack.c.h.bf16 %v598_v8  ;;  %v599_v22 = vld [vmem:[%s703_s22 + $0x20] sm:$0xff]   ;;  %v601_v28 = vld [vmem:[%s703_s22 + $0x30] sm:$0xff]   ;;  %v602_v29 = vld [vmem:[%s703_s22 + $0x38] sm:$0xff]  }
  0x12   : > { %v309_v14 = vmul.f32 %v534_v3, %v709_v1  ;;  %v310_v15 = vmul.f32 %v535_v4, %v709_v1  ;;  %v311_v16 = vmul.f32 %v538_v5, %v709_v1  ;;  %v312_v17 = vmul.f32 %v539_v6, %v709_v1  ;;  %v603_v50 = vld [vmem:[%s703_s22 + $0x40] sm:$0xff]   ;;  %v604_v51 = vld [vmem:[%s703_s22 + $0x48] sm:$0xff]   ;;  %v605_v56 = vld [vmem:[%s703_s22 + $0x50] sm:$0xff]  }
  0x13   : > { %v313_v18 = vmul.f32 %v542_v10, %v709_v1  ;;  %v314_v19 = vmul.f32 %v543_v11, %v709_v1  ;;  %v315_v20 = vmul.f32 %v546_v12, %v709_v1  ;;  %v316_v21 = vmul.f32 %v547_v13, %v709_v1  ;;  %v606_v57 = vld [vmem:[%s703_s22 + $0x58] sm:$0xff]  }
  0x14   : > { %v348_v24 = vadd.f32 %v714_v9, %v309_v14  ;;  %v349_v25 = vadd.f32 %v714_v9, %v310_v15  ;;  %v350_v26 = vadd.f32 %v714_v9, %v311_v16  ;;  %v351_v27 = vadd.f32 %v714_v9, %v312_v17  ;;  %v607_v16 = vld [vmem:[%s703_s22 + $0x60] sm:$0xff]   ;;  %v608_v17 = vld [vmem:[%s703_s22 + $0x68] sm:$0xff]  }
  0x15   : > { %v352_v30 = vadd.f32 %v714_v9, %v313_v18  ;;  %v353_v31 = vadd.f32 %v714_v9, %v314_v19  ;;  %v354_v32 = vadd.f32 %v714_v9, %v315_v20  ;;  %v355_v33 = vadd.f32 %v714_v9, %v316_v21 }
  0x16   : > { %380 = vst [vmem:[%s723_s29] sm:$0xff] %v348_v24  ;;  %381 = vst [vmem:[%s723_s29 + $0x8] sm:$0xff] %v349_v25  ;;  %v550_v34 = vunpack.c.l.bf16 %v599_v22  ;;  %v551_v35 = vunpack.c.h.bf16 %v599_v22  ;;  %v554_v36 = vunpack.c.l.bf16 %v600_v23  ;;  %v555_v37 = vunpack.c.h.bf16 %v600_v23  ;;  %v609_v22 = vld [vmem:[%s703_s22 + $0x70] sm:$0xff]   ;;  %v610_v23 = vld [vmem:[%s703_s22 + $0x78] sm:$0xff]  }
  0x17   : > { %382 = vst [vmem:[%s723_s29 + $0x10] sm:$0xff] %v350_v26  ;;  %383 = vst [vmem:[%s723_s29 + $0x18] sm:$0xff] %v351_v27  ;;  %v558_v38 = vunpack.c.l.bf16 %v601_v28  ;;  %v559_v39 = vunpack.c.h.bf16 %v601_v28  ;;  %v562_v40 = vunpack.c.l.bf16 %v602_v29  ;;  %v563_v41 = vunpack.c.h.bf16 %v602_v29 }
  0x18   : > { %384 = vst [vmem:[%s723_s29 + $0x20] sm:$0xff] %v352_v30  ;;  %385 = vst [vmem:[%s723_s29 + $0x28] sm:$0xff] %v353_v31  ;;  %v317_v42 = vmul.f32 %v550_v34, %v709_v1  ;;  %v318_v43 = vmul.f32 %v551_v35, %v709_v1  ;;  %v319_v44 = vmul.f32 %v554_v36, %v709_v1  ;;  %v566_v62 = vunpack.c.l.bf16 %v603_v50 }
  0x19   : > { %386 = vst [vmem:[%s723_s29 + $0x30] sm:$0xff] %v354_v32  ;;  %387 = vst [vmem:[%s723_s29 + $0x38] sm:$0xff] %v355_v33  ;;  %v320_v45 = vmul.f32 %v555_v37, %v709_v1  ;;  %v321_v46 = vmul.f32 %v558_v38, %v709_v1  ;;  %v322_v47 = vmul.f32 %v559_v39, %v709_v1  ;;  %v567_v63 = vunpack.c.h.bf16 %v603_v50 }
  0x1a   : > { %v323_v48 = vmul.f32 %v562_v40, %v709_v1  ;;  %v324_v49 = vmul.f32 %v563_v41, %v709_v1  ;;  %v356_v52 = vadd.f32 %v714_v9, %v317_v42  ;;  %v357_v53 = vadd.f32 %v714_v9, %v318_v43 }
  0x1b   : > { %v358_v54 = vadd.f32 %v714_v9, %v319_v44  ;;  %v359_v55 = vadd.f32 %v714_v9, %v320_v45  ;;  %v360_v58 = vadd.f32 %v714_v9, %v321_v46  ;;  %v361_v59 = vadd.f32 %v714_v9, %v322_v47 }
  0x1c   : > { %v362_v60 = vadd.f32 %v714_v9, %v323_v48  ;;  %v363_v61 = vadd.f32 %v714_v9, %v324_v49  ;;  %388 = vst [vmem:[%s723_s29 + $0x40] sm:$0xff] %v356_v52  ;;  %389 = vst [vmem:[%s723_s29 + $0x48] sm:$0xff] %v357_v53  ;;  %v570_v0 = vunpack.c.l.bf16 %v604_v51  ;;  %v571_v2 = vunpack.c.h.bf16 %v604_v51 }
  0x1d   : > { %390 = vst [vmem:[%s723_s29 + $0x50] sm:$0xff] %v358_v54  ;;  %391 = vst [vmem:[%s723_s29 + $0x58] sm:$0xff] %v359_v55  ;;  %v574_v3 = vunpack.c.l.bf16 %v605_v56  ;;  %v575_v4 = vunpack.c.h.bf16 %v605_v56  ;;  %v578_v5 = vunpack.c.l.bf16 %v606_v57  ;;  %v579_v6 = vunpack.c.h.bf16 %v606_v57 }
  0x1e   : > { %392 = vst [vmem:[%s723_s29 + $0x60] sm:$0xff] %v360_v58  ;;  %393 = vst [vmem:[%s723_s29 + $0x68] sm:$0xff] %v361_v59  ;;  %v325_v7 = vmul.f32 %v566_v62, %v709_v1  ;;  %v326_v8 = vmul.f32 %v567_v63, %v709_v1  ;;  %v327_v10 = vmul.f32 %v570_v0, %v709_v1  ;;  %v582_v28 = vunpack.c.l.bf16 %v607_v16 }
  0x1f   : > { %394 = vst [vmem:[%s723_s29 + $0x70] sm:$0xff] %v362_v60  ;;  %395 = vst [vmem:[%s723_s29 + $0x78] sm:$0xff] %v363_v61  ;;  %v328_v11 = vmul.f32 %v571_v2, %v709_v1  ;;  %v329_v12 = vmul.f32 %v574_v3, %v709_v1  ;;  %v330_v13 = vmul.f32 %v575_v4, %v709_v1  ;;  %v583_v29 = vunpack.c.h.bf16 %v607_v16 }
  0x20   : > { %v331_v14 = vmul.f32 %v578_v5, %v709_v1  ;;  %v332_v15 = vmul.f32 %v579_v6, %v709_v1  ;;  %v364_v18 = vadd.f32 %v714_v9, %v325_v7  ;;  %v365_v19 = vadd.f32 %v714_v9, %v326_v8 }
  0x21   : > { %v366_v20 = vadd.f32 %v714_v9, %v327_v10  ;;  %v367_v21 = vadd.f32 %v714_v9, %v328_v11  ;;  %v368_v24 = vadd.f32 %v714_v9, %v329_v12  ;;  %v369_v25 = vadd.f32 %v714_v9, %v330_v13 }
  0x22   : > { %v370_v26 = vadd.f32 %v714_v9, %v331_v14  ;;  %v371_v27 = vadd.f32 %v714_v9, %v332_v15  ;;  %396 = vst [vmem:[%s723_s29 + $0x80] sm:$0xff] %v364_v18  ;;  %397 = vst [vmem:[%s723_s29 + $0x88] sm:$0xff] %v365_v19  ;;  %v586_v30 = vunpack.c.l.bf16 %v608_v17  ;;  %v587_v31 = vunpack.c.h.bf16 %v608_v17 }
  0x23   : > { %398 = vst [vmem:[%s723_s29 + $0x90] sm:$0xff] %v366_v20  ;;  %399 = vst [vmem:[%s723_s29 + $0x98] sm:$0xff] %v367_v21  ;;  %v590_v32 = vunpack.c.l.bf16 %v609_v22  ;;  %v591_v33 = vunpack.c.h.bf16 %v609_v22  ;;  %v594_v34 = vunpack.c.l.bf16 %v610_v23  ;;  %v595_v35 = vunpack.c.h.bf16 %v610_v23 }
  0x24   : > { %400 = vst [vmem:[%s723_s29 + $0xa0] sm:$0xff] %v368_v24  ;;  %401 = vst [vmem:[%s723_s29 + $0xa8] sm:$0xff] %v369_v25  ;;  %v333_v36 = vmul.f32 %v582_v28, %v709_v1  ;;  %v334_v37 = vmul.f32 %v583_v29, %v709_v1  ;;  %v335_v38 = vmul.f32 %v586_v30, %v709_v1 }
  0x25   : > { %402 = vst [vmem:[%s723_s29 + $0xb0] sm:$0xff] %v370_v26  ;;  %403 = vst [vmem:[%s723_s29 + $0xb8] sm:$0xff] %v371_v27  ;;  %v336_v39 = vmul.f32 %v587_v31, %v709_v1  ;;  %v337_v40 = vmul.f32 %v590_v32, %v709_v1  ;;  %v338_v41 = vmul.f32 %v591_v33, %v709_v1 }
  0x26   : > { %v339_v42 = vmul.f32 %v594_v34, %v709_v1  ;;  %v340_v43 = vmul.f32 %v595_v35, %v709_v1  ;;  %v372_v44 = vadd.f32 %v714_v9, %v333_v36  ;;  %v373_v45 = vadd.f32 %v714_v9, %v334_v37 }
  0x27   : > { %v374_v46 = vadd.f32 %v714_v9, %v335_v38  ;;  %v375_v47 = vadd.f32 %v714_v9, %v336_v39  ;;  %v376_v48 = vadd.f32 %v714_v9, %v337_v40  ;;  %v377_v49 = vadd.f32 %v714_v9, %v338_v41 }
  0x28   : > { %v378_v50 = vadd.f32 %v714_v9, %v339_v42  ;;  %v379_v51 = vadd.f32 %v714_v9, %v340_v43  ;;  %404 = vst [vmem:[%s723_s29 + $0xc0] sm:$0xff] %v372_v44  ;;  %405 = vst [vmem:[%s723_s29 + $0xc8] sm:$0xff] %v373_v45 }
  0x29   : > { %406 = vst [vmem:[%s723_s29 + $0xd0] sm:$0xff] %v374_v46  ;;  %407 = vst [vmem:[%s723_s29 + $0xd8] sm:$0xff] %v375_v47 }
  0x2a   : > { %408 = vst [vmem:[%s723_s29 + $0xe0] sm:$0xff] %v376_v48  ;;  %409 = vst [vmem:[%s723_s29 + $0xe8] sm:$0xff] %v377_v49 }
  0x2b   : > { %410 = vst [vmem:[%s723_s29 + $0xf0] sm:$0xff] %v378_v50  ;;  %411 = vst [vmem:[%s723_s29 + $0xf8] sm:$0xff] %v379_v51 }
  0x2c PF: > { %s13_s14 = sadd.s32 1, %s657_s14   ;;  %s842_s12 = smov %s653_s13 }
  0x2d   : > { %p10_p5 = scmp.ge.s32.totalorder %s13_s14, 4   ;;  %s843_s13 = smov %s845_s15 }
  0x2f   :  { %12 = sbr.rel (!%p10_p5) target bundleno = 2 (0x2), region = 68 }

// kernel: _forward.6
= control target key start
LH: loop header
LB: loop body
LE: loop exit
PB: predicated region body
PF: predicated region fallthrough
CT: control target
= control target key end

     0   :  { %s1460_s15 = smov 0   ;;  %s1462_s16 = smov 0   ;;  %s1639_s0 = inlined_call_operand.vmem [shape: bf16[2,256,128], index: 0, kind: input, shape index: {}]   ;;  %s1640_s1 = inlined_call_operand.vmem [shape: bf16[128,128], index: 1, kind: input, shape index: {}]   ;;  %s1641_s2 = inlined_call_operand.vmem [shape: f32[1,128], index: 2, kind: input, shape index: {}]   ;;  %s1642_s3 = inlined_call_operand.vmem [shape: bf16[2,256,128], index: 3, kind: output, shape index: {0}]   ;;  %s1643_s4 = inlined_call_operand.vmem [shape: f32[2,8,128], index: 4, kind: output, shape index: {1}]  }
   0x1   :  { %s1464_s17 = smov 0  }
   0x2 LB: > { %s27_s18 = sadd.s32 1, %s1429_s16  ;;  %p1081_p0 = scmp.ge.s32.totalorder %s1433_s17, 1  ;;  %s1433_s17 = sphi %s1464_s17, %s15_s17   ;;  %s1429_s16 = sphi %s1462_s16, %s1645_s16   ;;  %s1425_s15 = sphi %s1460_s15, %s1644_s15  }
   0x3   : > { %p29_p1 = scmp.ge.s32.totalorder %s27_s18, 2  ;;  %p188_p2 = scmp.lt.s32.totalorder %s1433_s17, 3 }
   0x5   : > { %s1647_s18 = smov (%p29_p1, %s27_s18), 0  ;;  %p189_p3 = pnand %p1081_p0, %p188_p2 }
   0x6   : > { %p230_p4 = scmp.lt.s32.totalorder (!%p189_p3), %s1425_s15, 1 }
   0x7   : > { %192 = sbr.rel (%p189_p3) target bundleno = 332 (0x14c), region = 32 }
   0xc   : > { %v1387_v0 = vld [vmem:[%s1640_s1 + $0x38] sm:$0xff]   ;;  %v1388_v1 = vld [vmem:[%s1640_s1 + $0x30] sm:$0xff]   ;;  %s1649_s15 = smov (!%p230_p4, %s1425_s15), 1  ;;  %v1389_v2 = vld [vmem:[%s1640_s1 + $0x28] sm:$0xff]  }
   0xd   : > { %1299 = vmatprep.subr.bf16.mxu0 %v1387_v0  ;;  %1347 = vmatprep.subr.bf16.mxu1 %v1387_v0  ;;  %s1146_s25 = sshll.u32 %s1649_s15, 7  ;;  %v1390_v3 = vld [vmem:[%s1640_s1 + $0x20] sm:$0xff]   ;;  %v1391_v5 = vld [vmem:[%s1640_s1 + $0x18] sm:$0xff]   ;;  %v1392_v6 = vld [vmem:[%s1640_s1 + $0x10] sm:$0xff]   ;;  %s1086_s22 = sshll.u32 %s1649_s15, 3 }
   0xe   : > { %1300 = vmatpush3.bf16.msra.mxu0 %v1387_v0  ;;  %1355 = vmatpush3.bf16.msra.mxu1 %v1387_v0  ;;  %s1495_s28 = scalar_lea.vmem %s1639_s0, %s1146_s25  ;;  %v1393_v8 = vld [vmem:[%s1640_s1 + $0x8] sm:$0xff]   ;;  %v1394_v9 = vld [vmem:[%s1640_s1] sm:$0xff]   ;;  %s1546_s21 = scalar_lea.vmem %s1642_s3, %s1146_s25 }
   0xf   : > { %1301 = vmatprep.subr.bf16.mxu0 %v1388_v1  ;;  %1348 = vmatprep.subr.bf16.mxu1 %v1388_v1  ;;  %v1395_v4 = vld [vmem:[%s1495_s28] sm:$0xff]   ;;  %v1396_v10 = vld [vmem:[%s1495_s28 + $0x8] sm:$0xff]   ;;  %v1397_v12 = vld [vmem:[%s1495_s28 + $0x10] sm:$0xff]   ;;  %s255_s25 = scalar_lea.vmem %s1643_s4, %s1086_s22 }
  0x10   : > { %1315 = vmatprep.mubr.bf16.mxu0 %v1395_v4  ;;  %v1403_v7 = vld [vmem:[%s1495_s28 + $0x40] sm:$0xff]   ;;  %v1404_v11 = vld [vmem:[%s1495_s28 + $0x48] sm:$0xff]   ;;  %v1405_v13 = vld [vmem:[%s1495_s28 + $0x50] sm:$0xff]  }
  0x11   : > { %1331 = vmatprep.mubr.bf16.mxu1 %v1403_v7  ;;  %v1398_v14 = vld [vmem:[%s1495_s28 + $0x18] sm:$0xff]   ;;  %v1399_v16 = vld [vmem:[%s1495_s28 + $0x20] sm:$0xff]   ;;  %v1400_v18 = vld [vmem:[%s1495_s28 + $0x28] sm:$0xff]  }
  0x12   : > { %1302 = vmatpush3.bf16.msra.mxu0 %v1388_v1  ;;  %1356 = vmatpush3.bf16.msra.mxu1 %v1388_v1  ;;  %v1406_v15 = vld [vmem:[%s1495_s28 + $0x58] sm:$0xff]   ;;  %v1407_v17 = vld [vmem:[%s1495_s28 + $0x60] sm:$0xff]   ;;  %v1408_v19 = vld [vmem:[%s1495_s28 + $0x68] sm:$0xff]  }
  0x13   : > { %1303 = vmatprep.subr.bf16.mxu0 %v1389_v2  ;;  %1349 = vmatprep.subr.bf16.mxu1 %v1389_v2  ;;  %v1401_v20 = vld [vmem:[%s1495_s28 + $0x30] sm:$0xff]   ;;  %v1402_v22 = vld [vmem:[%s1495_s28 + $0x38] sm:$0xff]   ;;  %v1531_v24 = vld [vmem:[%s1641_s2] ss:$0 sm:$0xff] }
  0x14   : > { %v1409_v21 = vld [vmem:[%s1495_s28 + $0x70] sm:$0xff]   ;;  %v1410_v23 = vld [vmem:[%s1495_s28 + $0x78] sm:$0xff]  }
  0x16   : > { %1304 = vmatpush3.bf16.msra.mxu0 %v1389_v2  ;;  %1357 = vmatpush3.bf16.msra.mxu1 %v1389_v2 }
  0x17   : > { %1305 = vmatprep.subr.bf16.mxu0 %v1390_v3  ;;  %1350 = vmatprep.subr.bf16.mxu1 %v1390_v3 }
  0x1a   : > { %1306 = vmatpush3.bf16.msra.mxu0 %v1390_v3  ;;  %1358 = vmatpush3.bf16.msra.mxu1 %v1390_v3 }
  0x1b   : > { %1307 = vmatprep.subr.bf16.mxu0 %v1391_v5  ;;  %1351 = vmatprep.subr.bf16.mxu1 %v1391_v5 }
  0x1e   : > { %1308 = vmatpush3.bf16.msra.mxu0 %v1391_v5  ;;  %1359 = vmatpush3.bf16.msra.mxu1 %v1391_v5 }
  0x1f   : > { %1309 = vmatprep.subr.bf16.mxu0 %v1392_v6  ;;  %1352 = vmatprep.subr.bf16.mxu1 %v1392_v6 }
  0x22   : > { %1310 = vmatpush3.bf16.msra.mxu0 %v1392_v6  ;;  %1360 = vmatpush3.bf16.msra.mxu1 %v1392_v6 }
  0x23   : > { %1311 = vmatprep.subr.bf16.mxu0 %v1393_v8  ;;  %1353 = vmatprep.subr.bf16.mxu1 %v1393_v8 }
  0x26   : > { %1312 = vmatpush3.bf16.msra.mxu0 %v1393_v8  ;;  %1361 = vmatpush3.bf16.msra.mxu1 %v1393_v8 }
  0x27   : > { %1313 = vmatprep.subr.bf16.mxu0 %v1394_v9  ;;  %1354 = vmatprep.subr.bf16.mxu1 %v1394_v9 }
  0x2a   : > { %1314 = vmatpush3.bf16.msra.mxu0 %v1394_v9  ;;  %1362 = vmatpush3.bf16.msra.mxu1 %v1394_v9 }
  0x2d   : > { %1316 = vmatmul.mubr.bf16.vlgmr.msra.gmra.mxu0 %v1396_v10  ;;  %1332 = vmatmul.mubr.bf16.vlgmr.msra.gmra.mxu1 %v1404_v11 }
  0x2e   : > { %1319 = vmatprep.mubr.bf16.mxu0 %v1397_v12  ;;  %1335 = vmatprep.mubr.bf16.mxu1 %v1405_v13 }
  0x35   : > { %1320 = vmatmul.mubr.bf16.gmra.mxu0 %v1398_v14  ;;  %1336 = vmatmul.mubr.bf16.gmra.mxu1 %v1406_v15 }
  0x36   : > { %1323 = vmatprep.mubr.bf16.mxu0 %v1399_v16  ;;  %1339 = vmatprep.mubr.bf16.mxu1 %v1407_v17 }
  0x3d   : > { %1324 = vmatmul.mubr.bf16.gmra.mxu0 %v1400_v18  ;;  %1340 = vmatmul.mubr.bf16.gmra.mxu1 %v1408_v19 }
  0x3e   : > { %1327 = vmatprep.mubr.bf16.mxu0 %v1401_v20  ;;  %1343 = vmatprep.mubr.bf16.mxu1 %v1409_v21 }
  0x45   : > { %1328 = vmatmul.mubr.bf16.gmra.mxu0 %v1402_v22  ;;  %1344 = vmatmul.mubr.bf16.gmra.mxu1 %v1410_v23 }
  0xed   : > { %v1317_v25 = vpop.f32.mrf.mxu0  ;;  %v1333_v26 = vpop.f32.mrf.mxu1 }
  0xee   : > { %v563_v27 = vadd.f32 %v1333_v26, %v1531_v24  ;;  %v499_v28 = vadd.f32 %v1317_v25, %v1531_v24 }
  0xef   : > { %v490_v29 = vpop.f32.mrf.mxu0  ;;  %v554_v30 = vpop.f32.mrf.mxu1 }
  0xf0   : > { %v555_v32 = vadd.f32 %v1531_v24, %v554_v30  ;;  %v491_v34 = vadd.f32 %v1531_v24, %v490_v29  ;;  %v635_v36 = vmax.f32 %v563_v27, 0.0  ;;  %v619_v38 = vmax.f32 %v499_v28, 0.0 }
  0xf1   : > { %v1318_v31 = vpop.f32.mrf.mxu0  ;;  %v1334_v33 = vpop.f32.mrf.mxu1 }
  0xf2   : > { %v502_v35 = vadd.f32 %v1318_v31, %v1531_v24  ;;  %v566_v37 = vadd.f32 %v1334_v33, %v1531_v24  ;;  %v633_v46 = vmax.f32 %v555_v32, 0.0  ;;  %v617_v48 = vmax.f32 %v491_v34, 0.0 }
  0xf3   : > { %v493_v39 = vpop.f32.mrf.mxu0  ;;  %v557_v40 = vpop.f32.mrf.mxu1 }
  0xf4   : > { %v620_v41 = vmax.f32 %v502_v35, 0.0  ;;  %v494_v42 = vadd.f32 %v1531_v24, %v493_v39  ;;  %v636_v43 = vmax.f32 %v566_v37, 0.0  ;;  %v558_v44 = vadd.f32 %v1531_v24, %v557_v40 }
  0xf5   : > { %v1321_v45 = vpop.f32.mrf.mxu0  ;;  %v1337_v47 = vpop.f32.mrf.mxu1 }
  0xf6   : > { %v650_v49 = vpack.c.bf16 %v620_v41, %v619_v38  ;;  %v618_v50 = vmax.f32 %v494_v42, 0.0  ;;  %v1548_v51 = vpack.c.bf16 %v636_v43, %v635_v36  ;;  %v634_v53 = vmax.f32 %v558_v44, 0.0 }
  0xf7   : > { %v506_v52 = vpop.f32.mrf.mxu0  ;;  %v570_v54 = vpop.f32.mrf.mxu1  ;;  %v515_v57 = vadd.f32 %v1321_v45, %v1531_v24  ;;  %v579_v2 = vadd.f32 %v1337_v47, %v1531_v24 }
  0xf8   : > { %1260 = vst [vmem:[%s1546_s21 + $0x8] sm:$0xff] %v650_v49   ;;  %v649_v55 = vpack.c.bf16 %v618_v50, %v617_v48  ;;  %1268 = vst [vmem:[%s1546_s21 + $0x48] sm:$0xff] %v1548_v51   ;;  %v811_v56 = vunpack.c.l.bf16 %v650_v49  ;;  %v1554_v59 = vpack.c.bf16 %v634_v53, %v633_v46  ;;  %v507_v63 = vadd.f32 %v1531_v24, %v506_v52 }
  0xf9   : > { %v1322_v58 = vpop.f32.mrf.mxu0  ;;  %v1338_v60 = vpop.f32.mrf.mxu1  ;;  %v812_v8 = vunpack.c.h.bf16 %v650_v49  ;;  %v623_v10 = vmax.f32 %v515_v57, 0.0  ;;  %v639_v27 = vmax.f32 %v579_v2, 0.0  ;;  %v1570_v28 = vadd.f32 %v1531_v24, %v570_v54 }
  0xfa   : > { %1184 = vst [vmem:[%s1546_s21] sm:$0xff] %v649_v55   ;;  %v809_v61 = vunpack.c.l.bf16 %v649_v55  ;;  %v810_v62 = vunpack.c.h.bf16 %v649_v55  ;;  %v518_v0 = vadd.f32 %v1322_v58, %v1531_v24  ;;  %1267 = vst [vmem:[%s1546_s21 + $0x40] sm:$0xff] %v1554_v59   ;;  %v881_v9 = vmul.f32 %v811_v56, %v811_v56 }
  0xfb   : > { %v509_v1 = vpop.f32.mrf.mxu0  ;;  %v573_v3 = vpop.f32.mrf.mxu1  ;;  %v621_v16 = vmax.f32 %v507_v63, 0.0  ;;  %v882_v25 = vmul.f32 %v812_v8, %v812_v8  ;;  %v582_v38 = vadd.f32 %v1338_v60, %v1531_v24 }
  0xfc   : > { %v841_v4 = vadd.f32 %v810_v62, %v809_v61  ;;  %v879_v5 = vmul.f32 %v809_v61, %v809_v61  ;;  %v880_v6 = vmul.f32 %v810_v62, %v810_v62  ;;  %v510_v7 = vadd.f32 %v1531_v24, %v509_v1 }
  0xfd   : > { %v624_v11 = vmax.f32 %v518_v0, 0.0  ;;  %v1325_v12 = vpop.f32.mrf.mxu0  ;;  %v1563_v13 = vpop.f32.mrf.mxu1  ;;  %v640_v48 = vmax.f32 %v582_v38, 0.0  ;;  %v574_v53 = vadd.f32 %v1531_v24, %v573_v3 }
  0xfe   : > { %v842_v14 = vadd.f32 %v841_v4, %v811_v56  ;;  %v911_v15 = vadd.f32 %v880_v6, %v879_v5  ;;  %v622_v17 = vmax.f32 %v510_v7, 0.0  ;;  %v531_v19 = vadd.f32 %v1325_v12, %v1531_v24 }
  0xff   : > { %v652_v18 = vpack.c.bf16 %v624_v11, %v623_v10  ;;  %v522_v20 = vpop.f32.mrf.mxu0  ;;  %v1566_v21 = vpop.f32.mrf.mxu1  ;;  %v1582_v57 = vpack.c.bf16 %v640_v48, %v639_v27  ;;  %v637_v4 = vmax.f32 %v1570_v28, 0.0  ;;  %v638_v7 = vmax.f32 %v574_v53, 0.0 }
 0x100   : > { %v912_v22 = vadd.f32 %v911_v15, %v881_v9  ;;  %v651_v23 = vpack.c.bf16 %v622_v17, %v621_v16  ;;  %v843_v32 = vadd.f32 %v842_v14, %v812_v8  ;;  %v627_v35 = vmax.f32 %v531_v19, 0.0 }
 0x101   : > { %1262 = vst [vmem:[%s1546_s21 + $0x18] sm:$0xff] %v652_v18   ;;  %v1326_v26 = vpop.f32.mrf.mxu0  ;;  %v1572_v29 = vpop.f32.mrf.mxu1  ;;  %v815_v34 = vunpack.c.l.bf16 %v652_v18  ;;  %v523_v36 = vadd.f32 %v1531_v24, %v522_v20  ;;  %v816_v44 = vunpack.c.h.bf16 %v652_v18  ;;  %1270 = vst [vmem:[%s1546_s21 + $0x58] sm:$0xff] %v1582_v57   ;;  %v595_v12 = vadd.f32 %v1563_v13, %v1531_v24 }
 0x102   : > { %1261 = vst [vmem:[%s1546_s21 + $0x10] sm:$0xff] %v651_v23   ;;  %v813_v30 = vunpack.c.l.bf16 %v651_v23  ;;  %v814_v31 = vunpack.c.h.bf16 %v651_v23  ;;  %v534_v33 = vadd.f32 %v1326_v26, %v1531_v24  ;;  %v913_v42 = vadd.f32 %v912_v22, %v882_v25 }
 0x103   : > { %v525_v37 = vpop.f32.mrf.mxu0  ;;  %v1578_v39 = vpop.f32.mrf.mxu1  ;;  %v625_v54 = vmax.f32 %v523_v36, 0.0  ;;  %v885_v60 = vmul.f32 %v815_v34, %v815_v34  ;;  %v886_v63 = vmul.f32 %v816_v44, %v816_v44  ;;  %v1597_v27 = vpack.c.bf16 %v638_v7, %v637_v4 }
 0x104   : > { %v844_v40 = vadd.f32 %v843_v32, %v813_v30  ;;  %v883_v41 = vmul.f32 %v813_v30, %v813_v30  ;;  %v628_v43 = vmax.f32 %v534_v33, 0.0  ;;  %v884_v45 = vmul.f32 %v814_v31, %v814_v31 }
 0x105   : > { %v526_v46 = vadd.f32 %v1531_v24, %v525_v37  ;;  %v1329_v47 = vpop.f32.mrf.mxu0  ;;  %v1584_v58 = vpop.f32.mrf.mxu1  ;;  %v587_v13 = vadd.f32 %v1531_v24, %v1566_v21  ;;  %1269 = vst [vmem:[%s1546_s21 + $0x50] sm:$0xff] %v1597_v27  }
 0x106   : > { %v845_v49 = vadd.f32 %v844_v40, %v814_v31  ;;  %v914_v50 = vadd.f32 %v913_v42, %v883_v41  ;;  %v654_v52 = vpack.c.bf16 %v628_v43, %v627_v35  ;;  %v547_v1 = vadd.f32 %v1329_v47, %v1531_v24 }
 0x107   : > { %v626_v55 = vmax.f32 %v526_v46, 0.0  ;;  %v538_v56 = vpop.f32.mrf.mxu0  ;;  %v602_v14 = vpop.f32.mrf.mxu1  ;;  %v598_v35 = vadd.f32 %v1572_v29, %v1531_v24  ;;  %v643_v40 = vmax.f32 %v595_v12, 0.0  ;;  %v641_v43 = vmax.f32 %v587_v13, 0.0 }
 0x108   : > { %v846_v61 = vadd.f32 %v845_v49, %v815_v34  ;;  %v915_v62 = vadd.f32 %v914_v50, %v884_v45  ;;  %1264 = vst [vmem:[%s1546_s21 + $0x28] sm:$0xff] %v654_v52   ;;  %v539_v6 = vadd.f32 %v1531_v24, %v538_v56  ;;  %v819_v15 = vunpack.c.l.bf16 %v654_v52 }
 0x109   : > { %v653_v0 = vpack.c.bf16 %v626_v55, %v625_v54  ;;  %v1330_v2 = vpop.f32.mrf.mxu0  ;;  %v820_v16 = vunpack.c.h.bf16 %v654_v52  ;;  %v631_v22 = vmax.f32 %v547_v1, 0.0  ;;  %v1346_v33 = vpop.f32.mrf.mxu1  ;;  %v644_v52 = vmax.f32 %v598_v35, 0.0 }
 0x10a   : > { %v916_v3 = vadd.f32 %v915_v62, %v885_v60  ;;  %v847_v5 = vadd.f32 %v846_v61, %v816_v44  ;;  %v550_v10 = vadd.f32 %v1330_v2, %v1531_v24  ;;  %v629_v25 = vmax.f32 %v539_v6, 0.0 }
 0x10b   : > { %1263 = vst [vmem:[%s1546_s21 + $0x20] sm:$0xff] %v653_v0   ;;  %v817_v8 = vunpack.c.l.bf16 %v653_v0  ;;  %v818_v9 = vunpack.c.h.bf16 %v653_v0  ;;  %v541_v11 = vpop.f32.mrf.mxu0  ;;  %v889_v36 = vmul.f32 %v819_v15, %v819_v15  ;;  %v890_v41 = vmul.f32 %v820_v16, %v820_v16  ;;  %v605_v48 = vpop.f32.mrf.mxu1 }
 0x10c   : > { %v917_v17 = vadd.f32 %v916_v3, %v886_v63  ;;  %v542_v18 = vadd.f32 %v1531_v24, %v541_v11  ;;  %v632_v23 = vmax.f32 %v550_v10, 0.0  ;;  %v590_v29 = vadd.f32 %v1531_v24, %v1578_v39 }
 0x10d   : > { %v848_v19 = vadd.f32 %v847_v5, %v817_v8  ;;  %v887_v20 = vmul.f32 %v817_v8, %v817_v8  ;;  %v888_v30 = vmul.f32 %v818_v9, %v818_v9  ;;  %v611_v55 = vadd.f32 %v1584_v58, %v1531_v24 }
 0x10e   : > { %v630_v26 = vmax.f32 %v542_v18, 0.0  ;;  %v656_v32 = vpack.c.bf16 %v632_v23, %v631_v22  ;;  %v603_v56 = vadd.f32 %v1531_v24, %v602_v14  ;;  %v662_v60 = vpack.c.bf16 %v644_v52, %v643_v40 }
 0x10f   : > { %v849_v28 = vadd.f32 %v848_v19, %v818_v9  ;;  %v918_v31 = vadd.f32 %v917_v17, %v887_v20  ;;  %v642_v61 = vmax.f32 %v590_v29, 0.0  ;;  %v614_v62 = vadd.f32 %v1346_v33, %v1531_v24 }
 0x110   : > { %v655_v34 = vpack.c.bf16 %v630_v26, %v629_v25  ;;  %1266 = vst [vmem:[%s1546_s21 + $0x38] sm:$0xff] %v656_v32   ;;  %v823_v45 = vunpack.c.l.bf16 %v656_v32  ;;  %v824_v46 = vunpack.c.h.bf16 %v656_v32  ;;  %v606_v63 = vadd.f32 %v1531_v24, %v605_v48  ;;  %1272 = vst [vmem:[%s1546_s21 + $0x68] sm:$0xff] %v662_v60  }
 0x111   : > { %v850_v37 = vadd.f32 %v849_v28, %v819_v15  ;;  %v919_v38 = vadd.f32 %v918_v31, %v888_v30  ;;  %v647_v2 = vmax.f32 %v611_v55, 0.0  ;;  %v645_v4 = vmax.f32 %v603_v56, 0.0 }
 0x112   : > { %1265 = vst [vmem:[%s1546_s21 + $0x30] sm:$0xff] %v655_v34   ;;  %v821_v42 = vunpack.c.l.bf16 %v655_v34  ;;  %v822_v21 = vunpack.c.h.bf16 %v655_v34  ;;  %v825_v39 = vunpack.c.l.bf16 %v1554_v59  ;;  %v661_v3 = vpack.c.bf16 %v642_v61, %v641_v43 }
 0x113   : > { %v920_v44 = vadd.f32 %v919_v38, %v889_v36  ;;  %v851_v47 = vadd.f32 %v850_v37, %v820_v16  ;;  %v648_v5 = vmax.f32 %v614_v62, 0.0  ;;  %v893_v58 = vmul.f32 %v823_v45, %v823_v45 }
 0x114   : > { %v891_v49 = vmul.f32 %v821_v42, %v821_v42  ;;  %v892_v50 = vmul.f32 %v822_v21, %v822_v21  ;;  %v646_v8 = vmax.f32 %v606_v63, 0.0  ;;  %v894_v9 = vmul.f32 %v824_v46, %v824_v46  ;;  %1271 = vst [vmem:[%s1546_s21 + $0x60] sm:$0xff] %v661_v3  }
 0x115   : > { %v852_v53 = vadd.f32 %v851_v47, %v821_v42  ;;  %v921_v54 = vadd.f32 %v920_v44, %v890_v41  ;;  %v826_v10 = vunpack.c.h.bf16 %v1554_v59  ;;  %v664_v12 = vpack.c.bf16 %v648_v5, %v647_v2 }
 0x116   : > { %v663_v14 = vpack.c.bf16 %v646_v8, %v645_v4  ;;  %v827_v15 = vunpack.c.l.bf16 %v1548_v51  ;;  %v895_v17 = vmul.f32 %v825_v39, %v825_v39  ;;  %v828_v19 = vunpack.c.h.bf16 %v1548_v51 }
 0x117   : > { %v853_v0 = vadd.f32 %v852_v53, %v822_v21  ;;  %v922_v1 = vadd.f32 %v921_v54, %v891_v49  ;;  %1274 = vst [vmem:[%s1546_s21 + $0x78] sm:$0xff] %v664_v12   ;;  %v896_v22 = vmul.f32 %v826_v10, %v826_v10  ;;  %v829_v13 = vunpack.c.l.bf16 %v1597_v27 }
 0x118   : > { %1273 = vst [vmem:[%s1546_s21 + $0x70] sm:$0xff] %v663_v14   ;;  %v897_v25 = vmul.f32 %v827_v15, %v827_v15  ;;  %v898_v28 = vmul.f32 %v828_v19, %v828_v19  ;;  %v830_v31 = vunpack.c.h.bf16 %v1597_v27  ;;  %v831_v33 = vunpack.c.l.bf16 %v1582_v57 }
 0x119   : > { %v854_v6 = vadd.f32 %v853_v0, %v823_v45  ;;  %v923_v7 = vadd.f32 %v922_v1, %v892_v50  ;;  %v899_v35 = vmul.f32 %v829_v13, %v829_v13  ;;  %v832_v51 = vunpack.c.h.bf16 %v1582_v57 }
 0x11a   : > { %v900_v38 = vmul.f32 %v830_v31, %v830_v31  ;;  %v901_v41 = vmul.f32 %v831_v33, %v831_v33  ;;  %v833_v43 = vunpack.c.l.bf16 %v661_v3  ;;  %v835_v27 = vunpack.c.l.bf16 %v662_v60 }
 0x11b   : > { %v924_v24 = vadd.f32 %v923_v7, %v893_v58  ;;  %v855_v11 = vadd.f32 %v854_v6, %v824_v46  ;;  %v902_v44 = vmul.f32 %v832_v51, %v832_v51  ;;  %v834_v46 = vunpack.c.h.bf16 %v661_v3 }
 0x11c   : > { %v903_v49 = vmul.f32 %v833_v43, %v833_v43  ;;  %v836_v52 = vunpack.c.h.bf16 %v662_v60  ;;  %v905_v57 = vmul.f32 %v835_v27, %v835_v27  ;;  %v837_v61 = vunpack.c.l.bf16 %v663_v14 }
 0x11d   : > { %v856_v16 = vadd.f32 %v855_v11, %v825_v39  ;;  %v925_v18 = vadd.f32 %v924_v24, %v894_v9  ;;  %v904_v53 = vmul.f32 %v834_v46, %v834_v46  ;;  %v838_v0 = vunpack.c.h.bf16 %v663_v14 }
 0x11e   : > { %v906_v62 = vmul.f32 %v836_v52, %v836_v52  ;;  %v839_v2 = vunpack.c.l.bf16 %v664_v12  ;;  %v907_v39 = vmul.f32 %v837_v61, %v837_v61  ;;  %v840_v5 = vunpack.c.h.bf16 %v664_v12 }
 0x11f   : > { %v857_v20 = vadd.f32 %v856_v16, %v826_v10  ;;  %v926_v23 = vadd.f32 %v925_v18, %v895_v17  ;;  %v908_v6 = vmul.f32 %v838_v0, %v838_v0 }
 0x120   : > { %v909_v7 = vmul.f32 %v839_v2, %v839_v2  ;;  %v910_v10 = vmul.f32 %v840_v5, %v840_v5 }
 0x121   : > { %v858_v26 = vadd.f32 %v857_v20, %v827_v15  ;;  %v927_v59 = vadd.f32 %v926_v23, %v896_v22 }
 0x123   : > { %v928_v30 = vadd.f32 %v927_v59, %v897_v25  ;;  %v859_v32 = vadd.f32 %v858_v26, %v828_v19 }
 0x125   : > { %v860_v34 = vadd.f32 %v859_v32, %v829_v13  ;;  %v929_v36 = vadd.f32 %v928_v30, %v898_v28 }
 0x127   : > { %v861_v37 = vadd.f32 %v860_v34, %v830_v31  ;;  %v930_v40 = vadd.f32 %v929_v36, %v899_v35 }
 0x129   : > { %v862_v42 = vadd.f32 %v861_v37, %v831_v33  ;;  %v931_v21 = vadd.f32 %v930_v40, %v900_v38 }
 0x12b   : > { %v932_v45 = vadd.f32 %v931_v21, %v901_v41  ;;  %v863_v47 = vadd.f32 %v862_v42, %v832_v51 }
 0x12d   : > { %v864_v48 = vadd.f32 %v863_v47, %v833_v43  ;;  %v933_v50 = vadd.f32 %v932_v45, %v902_v44 }
 0x12f   : > { %v865_v29 = vadd.f32 %v864_v48, %v834_v46  ;;  %v934_v54 = vadd.f32 %v933_v50, %v903_v49 }
 0x131   : > { %v866_v55 = vadd.f32 %v865_v29, %v835_v27  ;;  %v935_v56 = vadd.f32 %v934_v54, %v904_v53 }
 0x133   : > { %v936_v63 = vadd.f32 %v935_v56, %v905_v57  ;;  %v867_v1 = vadd.f32 %v866_v55, %v836_v52 }
 0x135   : > { %v868_v4 = vadd.f32 %v867_v1, %v837_v61  ;;  %v937_v3 = vadd.f32 %v936_v63, %v906_v62 }
 0x137   : > { %v869_v58 = vadd.f32 %v868_v4, %v838_v0  ;;  %v938_v60 = vadd.f32 %v937_v3, %v907_v39 }
 0x139   : > { %v870_v8 = vadd.f32 %v869_v58, %v839_v2  ;;  %v939_v9 = vadd.f32 %v938_v60, %v908_v6 }
 0x13b   : > { %v871_v24 = vadd.f32 %v870_v8, %v840_v5  ;;  %v940_v11 = vadd.f32 %v939_v9, %v909_v7 }
 0x13d   : > { %v872_v15 = vrot.slane %v871_v24, 4  ;;  %v941_v16 = vadd.f32 %v940_v11, %v910_v10 }
 0x13f   : > { %v873_v17 = vadd.f32 %v872_v15, %v871_v24  ;;  %v942_v14 = vrot.slane %v941_v16, 4 }
 0x141   : > { %v874_v18 = vrot.slane %v873_v17, 2  ;;  %v943_v19 = vadd.f32 %v942_v14, %v941_v16 }
 0x143   : > { %v875_v20 = vadd.f32 %v874_v18, %v873_v17  ;;  %v944_v22 = vrot.slane %v943_v19, 2 }
 0x145   : > { %v876_v12 = vrot.slane %v875_v20, 1  ;;  %v945_v23 = vadd.f32 %v944_v22, %v943_v19 }
 0x147   : > { %v877_v25 = vadd.f32 %v876_v12, %v875_v20  ;;  %v946_v26 = vrot.slane %v945_v23, 1 }
 0x149   : > { %878 = vst [vmem:[%s255_s25] sm:$0x1] %v877_v25  ;;  %v947_v59 = vadd.f32 %v946_v26, %v945_v23 }
 0x14b   : > { %948 = vst [vmem:[%s255_s25 + $0x1] sm:$0x1] %v947_v59 }
 0x14c PF: > { %s15_s17 = sadd.s32 1, %s1433_s17   ;;  %s1644_s15 = smov %s1429_s16 }
 0x14d   : > { %p12_p5 = scmp.ge.s32.totalorder %s15_s17, 4   ;;  %s1645_s16 = smov %s1647_s18 }
 0x14f   :  { %14 = sbr.rel (!%p12_p5) target bundleno = 2 (0x2), region = 74 }

// kernel: _forward.8
= control target key start
LH: loop header
LB: loop body
LE: loop exit
PB: predicated region body
PF: predicated region fallthrough
CT: control target
= control target key end

     0   :  { %s966_s15 = smov 0   ;;  %s968_s16 = smov 0   ;;  %s1072_s0 = inlined_call_operand.vmem [shape: bf16[1,128,256], index: 0, kind: input, shape index: {}]   ;;  %s1073_s1 = inlined_call_operand.vmem [shape: bf16[256,128], index: 1, kind: input, shape index: {}]   ;;  %s1074_s2 = inlined_call_operand.vmem [shape: f32[1,128], index: 2, kind: input, shape index: {}]   ;;  %s1075_s3 = inlined_call_operand.vmem [shape: bf16[1,128,128], index: 3, kind: output, shape index: {0}]   ;;  %s1076_s4 = inlined_call_operand.vmem [shape: f32[1,16,128], index: 4, kind: output, shape index: {1}]  }
   0x1   :  { %s970_s17 = smov 0  }
   0x2 LB: > { %s24_s18 = sadd.s32 1, %s935_s16  ;;  %p735_p0 = scmp.ge.s32.totalorder %s939_s17, 1  ;;  %s939_s17 = sphi %s970_s17, %s15_s17   ;;  %s935_s16 = sphi %s968_s16, %s1078_s16   ;;  %s931_s15 = sphi %s966_s15, %s1077_s15  }
   0x3   : > { %p25_p1 = scmp.ge.s32.totalorder %s24_s18, 2  ;;  %p189_p2 = scmp.lt.s32.totalorder %s939_s17, 3 }
   0x5   : > { %s1080_s18 = smov (%p25_p1, %s24_s18), 0  ;;  %p190_p3 = pnand %p735_p0, %p189_p2 }
   0x6   : > { %s736_s21 = sshll.u32 (!%p190_p3), %s931_s15, 3  ;;  %p255_p5 = scmp.lt.s32.totalorder (!%p190_p3), %s931_s15, 1 }
   0x7   : > { %193 = sbr.rel (%p190_p3) target bundleno = 287 (0x11f), region = 32  ;;  %p235_p4 = scmp.lt.s32.totalorder (!%p190_p3), %s736_s21, 15 }
   0xc   : > { %v889_v0 = vld [vmem:[%s1073_s1 + $0x78] sm:$0xff]   ;;  %v891_v2 = vld [vmem:[%s1073_s1 + $0x70] sm:$0xff]   ;;  %v893_v4 = vld [vmem:[%s1073_s1 + $0x68] sm:$0xff]   ;;  %s1082_s21 = smov (!%p235_p4, %s736_s21), 15  ;;  %s1084_s15 = smov (!%p255_p5, %s931_s15), 1 }
   0xd   : > { %v890_v1 = vld [vmem:[%s1073_s1 + $0x38] sm:$0xff]   ;;  %809 = vmatprep.subr.bf16.mxu0 %v889_v0  ;;  %849 = vmatprep.subr.bf16.mxu1 %v889_v0  ;;  %v892_v3 = vld [vmem:[%s1073_s1 + $0x30] sm:$0xff]   ;;  %v894_v5 = vld [vmem:[%s1073_s1 + $0x28] sm:$0xff]   ;;  %s777_s10 = sshll.u32 %s1082_s21, 3  ;;  %s740_s11 = sshll.u32 %s1082_s21, 2 }
   0xe   : > { %810 = vmatpush3.bf16.msra.mxu0 %v890_v1  ;;  %857 = vmatpush3.bf16.msra.mxu1 %v890_v1  ;;  %v895_v6 = vld [vmem:[%s1073_s1 + $0x60] sm:$0xff]   ;;  %v897_v8 = vld [vmem:[%s1073_s1 + $0x58] sm:$0xff]   ;;  %s1020_s19 = scalar_lea.vmem %s1072_s0, %s777_s10  ;;  %v899_v10 = vld [vmem:[%s1073_s1 + $0x50] sm:$0xff]   ;;  %s251_s14 = scalar_lea.vmem %s1075_s3, %s740_s11 }
   0xf   : > { %811 = vmatprep.subr.bf16.mxu0 %v891_v2  ;;  %850 = vmatprep.subr.bf16.mxu1 %v891_v2  ;;  %v896_v7 = vld [vmem:[%s1073_s1 + $0x20] sm:$0xff]   ;;  %v898_v9 = vld [vmem:[%s1073_s1 + $0x18] sm:$0xff]   ;;  %v900_v13 = vld [vmem:[%s1073_s1 + $0x10] sm:$0xff]   ;;  %s741_s21 = sshll.u32 %s1084_s15, 3 }
  0x10   : > { %v907_v11 = vld [vmem:[%s1020_s19 + $0x4] ss:$8 sps:$4 sm:$0xff]   ;;  %v905_v18 = vld [vmem:[%s1020_s19] ss:$8 sps:$4 sm:$0xff]   ;;  %v911_v20 = vld [vmem:[%s1020_s19 + $0x14] ss:$8 sps:$4 sm:$0xff]   ;;  %s260_s22 = scalar_lea.vmem %s1076_s4, %s741_s21 }
  0x11   : > { %v910_v12 = vld [vmem:[%s1020_s19 + $0x24] ss:$8 sps:$4 sm:$0xff]   ;;  %477 = vmatprep.mubr.bf16.mxu0 %v907_v11  ;;  %v908_v19 = vld [vmem:[%s1020_s19 + $0x20] ss:$8 sps:$4 sm:$0xff]   ;;  %v914_v21 = vld [vmem:[%s1020_s19 + $0x34] ss:$8 sps:$4 sm:$0xff]  }
  0x12   : > { %812 = vmatpush3.bf16.msra.mxu0 %v892_v3  ;;  %858 = vmatpush3.bf16.msra.mxu1 %v892_v3  ;;  %v901_v14 = vld [vmem:[%s1073_s1 + $0x48] sm:$0xff]   ;;  %v903_v16 = vld [vmem:[%s1073_s1 + $0x40] sm:$0xff]   ;;  %v913_v22 = vld [vmem:[%s1020_s19 + $0x10] ss:$8 sps:$4 sm:$0xff]  }
  0x13   : > { %813 = vmatprep.subr.bf16.mxu0 %v893_v4  ;;  %851 = vmatprep.subr.bf16.mxu1 %v893_v4  ;;  %v902_v15 = vld [vmem:[%s1073_s1 + $0x8] sm:$0xff]   ;;  %v904_v17 = vld [vmem:[%s1073_s1] sm:$0xff]   ;;  %v916_v23 = vld [vmem:[%s1020_s19 + $0x30] ss:$8 sps:$4 sm:$0xff]  }
  0x14   : > { %493 = vmatprep.mubr.bf16.mxu1 %v910_v12  ;;  %v742_v32 = vld [vmem:[%s1074_s2] ss:$0 sm:$0xff] }
  0x16   : > { %814 = vmatpush3.bf16.msra.mxu0 %v894_v5  ;;  %859 = vmatpush3.bf16.msra.mxu1 %v894_v5 }
  0x17   : > { %815 = vmatprep.subr.bf16.mxu0 %v895_v6  ;;  %852 = vmatprep.subr.bf16.mxu1 %v895_v6 }
  0x1a   : > { %816 = vmatpush3.bf16.msra.mxu0 %v896_v7  ;;  %860 = vmatpush3.bf16.msra.mxu1 %v896_v7 }
  0x1b   : > { %817 = vmatprep.subr.bf16.mxu0 %v897_v8  ;;  %853 = vmatprep.subr.bf16.mxu1 %v897_v8 }
  0x1e   : > { %818 = vmatpush3.bf16.msra.mxu0 %v898_v9  ;;  %861 = vmatpush3.bf16.msra.mxu1 %v898_v9 }
  0x1f   : > { %819 = vmatprep.subr.bf16.mxu0 %v899_v10  ;;  %854 = vmatprep.subr.bf16.mxu1 %v899_v10 }
  0x22   : > { %820 = vmatpush3.bf16.msra.mxu0 %v900_v13  ;;  %862 = vmatpush3.bf16.msra.mxu1 %v900_v13 }
  0x23   : > { %821 = vmatprep.subr.bf16.mxu0 %v901_v14  ;;  %855 = vmatprep.subr.bf16.mxu1 %v901_v14 }
  0x26   : > { %822 = vmatpush3.bf16.msra.mxu0 %v902_v15  ;;  %863 = vmatpush3.bf16.msra.mxu1 %v902_v15 }
  0x27   : > { %823 = vmatprep.subr.bf16.mxu0 %v903_v16  ;;  %856 = vmatprep.subr.bf16.mxu1 %v903_v16 }
  0x2a   : > { %824 = vmatpush3.bf16.msra.mxu0 %v904_v17  ;;  %864 = vmatpush3.bf16.msra.mxu1 %v904_v17 }
  0x2d   : > { %478 = vmatmul.mubr.bf16.vlgmr.msra.gmra.mxu0 %v905_v18  ;;  %494 = vmatmul.mubr.bf16.vlgmr.msra.gmra.mxu1 %v908_v19 }
  0x2e   : > { %485 = vmatprep.mubr.bf16.mxu0 %v911_v20  ;;  %501 = vmatprep.mubr.bf16.mxu1 %v914_v21 }
  0x35   : > { %486 = vmatmul.mubr.bf16.gmra.mxu0 %v913_v22  ;;  %502 = vmatmul.mubr.bf16.gmra.mxu1 %v916_v23 }
  0xed   : > { %v825_v24 = vpop.f32.mrf.mxu0  ;;  %v837_v25 = vpop.f32.mrf.mxu1 }
  0xef   : > { %v826_v26 = vpop.f32.mrf.mxu0  ;;  %v838_v27 = vpop.f32.mrf.mxu1 }
  0xf0   : > { %v839_v28 = vadd.f32 %v838_v27, %v837_v25  ;;  %v827_v31 = vadd.f32 %v826_v26, %v825_v24 }
  0xf1   : > { %v828_v29 = vpop.f32.mrf.mxu0  ;;  %v840_v30 = vpop.f32.mrf.mxu1 }
  0xf2   : > { %v496_v35 = vadd.f32 %v839_v28, %v742_v32  ;;  %v480_v40 = vadd.f32 %v827_v31, %v742_v32 }
  0xf3   : > { %v829_v33 = vpop.f32.mrf.mxu0  ;;  %v841_v34 = vpop.f32.mrf.mxu1 }
  0xf4   : > { %v830_v36 = vadd.f32 %v829_v33, %v828_v29  ;;  %v842_v37 = vadd.f32 %v841_v34, %v840_v30 }
  0xf5   : > { %v831_v38 = vpop.f32.mrf.mxu0  ;;  %v843_v39 = vpop.f32.mrf.mxu1 }
  0xf6   : > { %v483_v41 = vadd.f32 %v830_v36, %v742_v32  ;;  %v499_v42 = vadd.f32 %v842_v37, %v742_v32 }
  0xf7   : > { %v832_v43 = vpop.f32.mrf.mxu0  ;;  %v844_v44 = vpop.f32.mrf.mxu1 }
  0xf8   : > { %v510_v45 = vpack.c.bf16 %v483_v41, %v480_v40  ;;  %v512_v46 = vpack.c.bf16 %v499_v42, %v496_v35  ;;  %v845_v48 = vadd.f32 %v844_v44, %v843_v39  ;;  %v833_v50 = vadd.f32 %v832_v43, %v831_v38 }
  0xf9   : > { %v834_v47 = vpop.f32.mrf.mxu0  ;;  %v846_v49 = vpop.f32.mrf.mxu1 }
  0xfa   : > { %790 = vst [vmem:[%s251_s14] sm:$0xff] %v510_v45   ;;  %807 = vst [vmem:[%s251_s14 + $0x10] sm:$0xff] %v512_v46   ;;  %v550_v53 = vunpack.c.l.bf16 %v510_v45  ;;  %v551_v54 = vunpack.c.h.bf16 %v510_v45  ;;  %v504_v55 = vadd.f32 %v845_v48, %v742_v32  ;;  %v488_v58 = vadd.f32 %v833_v50, %v742_v32 }
  0xfb   : > { %v835_v51 = vpop.f32.mrf.mxu0  ;;  %v847_v52 = vpop.f32.mrf.mxu1  ;;  %v554_v5 = vunpack.c.l.bf16 %v512_v46  ;;  %v555_v8 = vunpack.c.h.bf16 %v512_v46 }
  0xfc   : > { %v836_v56 = vadd.f32 %v835_v51, %v834_v47  ;;  %v848_v57 = vadd.f32 %v847_v52, %v846_v49  ;;  %v572_v61 = vmul.f32 %v550_v53, %v550_v53  ;;  %v573_v62 = vmul.f32 %v551_v54, %v551_v54 }
  0xfd   : > { %v558_v1 = vadd.f32 %v551_v54, %v550_v53  ;;  %v576_v12 = vmul.f32 %v554_v5, %v554_v5  ;;  %v577_v16 = vmul.f32 %v555_v8, %v555_v8 }
  0xfe   : > { %v491_v59 = vadd.f32 %v836_v56, %v742_v32  ;;  %v507_v60 = vadd.f32 %v848_v57, %v742_v32  ;;  %v580_v4 = vadd.f32 %v573_v62, %v572_v61 }
 0x100   : > { %v511_v63 = vpack.c.bf16 %v491_v59, %v488_v58  ;;  %v513_v0 = vpack.c.bf16 %v507_v60, %v504_v55 }
 0x102   : > { %806 = vst [vmem:[%s251_s14 + $0x8] sm:$0xff] %v511_v63   ;;  %v552_v2 = vunpack.c.l.bf16 %v511_v63  ;;  %v553_v3 = vunpack.c.h.bf16 %v511_v63  ;;  %808 = vst [vmem:[%s251_s14 + $0x18] sm:$0xff] %v513_v0   ;;  %v556_v15 = vunpack.c.l.bf16 %v513_v0  ;;  %v557_v18 = vunpack.c.h.bf16 %v513_v0 }
 0x104   : > { %v559_v6 = vadd.f32 %v558_v1, %v552_v2  ;;  %v574_v7 = vmul.f32 %v552_v2, %v552_v2  ;;  %v575_v10 = vmul.f32 %v553_v3, %v553_v3  ;;  %v578_v21 = vmul.f32 %v556_v15, %v556_v15 }
 0x105   : > { %v579_v24 = vmul.f32 %v557_v18, %v557_v18 }
 0x106   : > { %v560_v9 = vadd.f32 %v559_v6, %v553_v3  ;;  %v581_v11 = vadd.f32 %v580_v4, %v574_v7 }
 0x108   : > { %v561_v13 = vadd.f32 %v560_v9, %v554_v5  ;;  %v582_v14 = vadd.f32 %v581_v11, %v575_v10 }
 0x10a   : > { %v583_v17 = vadd.f32 %v582_v14, %v576_v12  ;;  %v562_v19 = vadd.f32 %v561_v13, %v555_v8 }
 0x10c   : > { %v563_v20 = vadd.f32 %v562_v19, %v556_v15  ;;  %v584_v22 = vadd.f32 %v583_v17, %v577_v16 }
 0x10e   : > { %v564_v23 = vadd.f32 %v563_v20, %v557_v18  ;;  %v585_v25 = vadd.f32 %v584_v22, %v578_v21 }
 0x110   : > { %v565_v26 = vrot.slane %v564_v23, 4  ;;  %v586_v27 = vadd.f32 %v585_v25, %v579_v24 }
 0x112   : > { %v566_v28 = vadd.f32 %v565_v26, %v564_v23  ;;  %v587_v29 = vrot.slane %v586_v27, 4 }
 0x114   : > { %v567_v30 = vrot.slane %v566_v28, 2  ;;  %v588_v31 = vadd.f32 %v587_v29, %v586_v27 }
 0x116   : > { %v568_v32 = vadd.f32 %v567_v30, %v566_v28  ;;  %v589_v33 = vrot.slane %v588_v31, 2 }
 0x118   : > { %v569_v34 = vrot.slane %v568_v32, 1  ;;  %v590_v35 = vadd.f32 %v589_v33, %v588_v31 }
 0x11a   : > { %v570_v36 = vadd.f32 %v569_v34, %v568_v32  ;;  %v591_v37 = vrot.slane %v590_v35, 1 }
 0x11c   : > { %571 = vst [vmem:[%s260_s22] sm:$0x1] %v570_v36  ;;  %v592_v38 = vadd.f32 %v591_v37, %v590_v35 }
 0x11e   : > { %593 = vst [vmem:[%s260_s22 + $0x1] sm:$0x1] %v592_v38 }
 0x11f PF: > { %s15_s17 = sadd.s32 1, %s939_s17   ;;  %s1077_s15 = smov %s935_s16 }
 0x120   : > { %p12_p6 = scmp.ge.s32.totalorder %s15_s17, 4   ;;  %s1078_s16 = smov %s1080_s18 }
 0x122   :  { %14 = sbr.rel (!%p12_p6) target bundleno = 2 (0x2), region = 74 }

// kernel: _forward.9
= control target key start
LH: loop header
LB: loop body
LE: loop exit
PB: predicated region body
PF: predicated region fallthrough
CT: control target
= control target key end

     0   :  { %s1013_s15 = smov 0   ;;  %s1015_s16 = smov 0   ;;  %s1157_s0 = inlined_call_operand.vmem [shape: bf16[1,32,512], index: 0, kind: input, shape index: {}]   ;;  %s1158_s1 = inlined_call_operand.vmem [shape: bf16[512,128], index: 1, kind: input, shape index: {}]   ;;  %s1159_s2 = inlined_call_operand.vmem [shape: f32[1,128], index: 2, kind: input, shape index: {}]   ;;  %s1160_s3 = inlined_call_operand.vmem [shape: bf16[1,32,128], index: 3, kind: output, shape index: {0}]   ;;  %s1161_s4 = inlined_call_operand.vmem [shape: f32[1,16,128], index: 4, kind: output, shape index: {1}]  }
   0x1   :  { %s1017_s17 = smov 0  }
   0x2 LB: > { %s24_s18 = sadd.s32 1, %s982_s16  ;;  %p802_p0 = scmp.ge.s32.totalorder %s986_s17, 1  ;;  %s986_s17 = sphi %s1017_s17, %s15_s17   ;;  %s982_s16 = sphi %s1015_s16, %s1163_s16   ;;  %s978_s15 = sphi %s1013_s15, %s1162_s15  }
   0x3   : > { %p25_p1 = scmp.ge.s32.totalorder %s24_s18, 2  ;;  %p189_p2 = scmp.lt.s32.totalorder %s986_s17, 3 }
   0x5   : > { %s1165_s18 = smov (%p25_p1, %s24_s18), 0  ;;  %p190_p3 = pnand %p802_p0, %p189_p2 }
   0x6   : > { %s803_s29 = sshll.u32 (!%p190_p3), %s978_s15, 1  ;;  %p255_p5 = scmp.lt.s32.totalorder (!%p190_p3), %s978_s15, 1 }
   0x7   : > { %193 = sbr.rel (%p190_p3) target bundleno = 272 (0x110), region = 32  ;;  %p235_p4 = scmp.lt.s32.totalorder (!%p190_p3), %s803_s29, 3 }
   0xc   : > { %v926_v0 = vld [vmem:[%s1158_s1 + $0x78] sm:$0xff]   ;;  %v930_v4 = vld [vmem:[%s1158_s1 + $0x70] sm:$0xff]   ;;  %v934_v8 = vld [vmem:[%s1158_s1 + $0x68] sm:$0xff]   ;;  %s1167_s29 = smov (!%p235_p4, %s803_s29), 3  ;;  %s1169_s15 = smov (!%p255_p5, %s978_s15), 1 }
   0xd   : > { %v927_v1 = vld [vmem:[%s1158_s1 + $0xf8] sm:$0xff]   ;;  %858 = vmatprep.subr.bf16.mxu0 %v926_v0  ;;  %v931_v5 = vld [vmem:[%s1158_s1 + $0xf0] sm:$0xff]   ;;  %v935_v9 = vld [vmem:[%s1158_s1 + $0xe8] sm:$0xff]   ;;  %s850_s5 = sshll.u32 %s1167_s29, 4  ;;  %s807_s25 = sshll.u32 %s1167_s29, 2 }
   0xe   : > { %v928_v2 = vld [vmem:[%s1158_s1 + $0x38] sm:$0xff]   ;;  %880 = vmatprep.subr.bf16.mxu1 %v927_v1  ;;  %v932_v6 = vld [vmem:[%s1158_s1 + $0x30] sm:$0xff]   ;;  %v936_v10 = vld [vmem:[%s1158_s1 + $0x28] sm:$0xff]   ;;  %s241_s14 = scalar_lea.vmem %s1157_s0, %s850_s5  ;;  %s251_s28 = scalar_lea.vmem %s1160_s3, %s807_s25 }
   0xf   : > { %v929_v3 = vld [vmem:[%s1158_s1 + $0xb8] sm:$0xff]   ;;  %859 = vmatpush3.bf16.msra.mxu0 %v928_v2  ;;  %v933_v7 = vld [vmem:[%s1158_s1 + $0xb0] sm:$0xff]   ;;  %v937_v11 = vld [vmem:[%s1158_s1 + $0xa8] sm:$0xff]   ;;  %s808_s29 = sshll.u32 %s1169_s15, 3 }
  0x10   : > { %881 = vmatpush3.bf16.msra.mxu1 %v929_v3  ;;  %860 = vmatprep.subr.bf16.mxu0 %v930_v4  ;;  %v938_v12 = vld [vmem:[%s1158_s1 + $0x60] sm:$0xff]   ;;  %v942_v16 = vld [vmem:[%s1158_s1 + $0x58] sm:$0xff]   ;;  %v946_v20 = vld [vmem:[%s1158_s1 + $0x50] sm:$0xff]   ;;  %s260_s6 = scalar_lea.vmem %s1161_s4, %s808_s29 }
  0x11   : > { %882 = vmatprep.subr.bf16.mxu1 %v931_v5  ;;  %v939_v13 = vld [vmem:[%s1158_s1 + $0xe0] sm:$0xff]   ;;  %v943_v17 = vld [vmem:[%s1158_s1 + $0xd8] sm:$0xff]   ;;  %v947_v21 = vld [vmem:[%s1158_s1 + $0xd0] sm:$0xff]  }
  0x12   : > { %v940_v14 = vld [vmem:[%s1158_s1 + $0x20] sm:$0xff]   ;;  %v944_v18 = vld [vmem:[%s1158_s1 + $0x18] sm:$0xff]   ;;  %v948_v22 = vld [vmem:[%s1158_s1 + $0x10] sm:$0xff]  }
  0x13   : > { %861 = vmatpush3.bf16.msra.mxu0 %v932_v6  ;;  %v941_v15 = vld [vmem:[%s1158_s1 + $0xa0] sm:$0xff]   ;;  %v945_v19 = vld [vmem:[%s1158_s1 + $0x98] sm:$0xff]   ;;  %v949_v23 = vld [vmem:[%s1158_s1 + $0x90] sm:$0xff]  }
  0x14   : > { %883 = vmatpush3.bf16.msra.mxu1 %v933_v7  ;;  %862 = vmatprep.subr.bf16.mxu0 %v934_v8  ;;  %v950_v24 = vld [vmem:[%s1158_s1 + $0x48] sm:$0xff]   ;;  %v954_v28 = vld [vmem:[%s1158_s1 + $0x40] sm:$0xff]  }
  0x15   : > { %884 = vmatprep.subr.bf16.mxu1 %v935_v9  ;;  %v951_v25 = vld [vmem:[%s1158_s1 + $0xc8] sm:$0xff]   ;;  %v955_v29 = vld [vmem:[%s1158_s1 + $0xc0] sm:$0xff]  }
  0x16   : > { %v952_v26 = vld [vmem:[%s1158_s1 + $0x8] sm:$0xff]   ;;  %v956_v30 = vld [vmem:[%s1158_s1] sm:$0xff]  }
  0x17   : > { %863 = vmatpush3.bf16.msra.mxu0 %v936_v10  ;;  %v953_v27 = vld [vmem:[%s1158_s1 + $0x88] sm:$0xff]   ;;  %v957_v31 = vld [vmem:[%s1158_s1 + $0x80] sm:$0xff]  }
  0x18   : > { %885 = vmatpush3.bf16.msra.mxu1 %v937_v11  ;;  %864 = vmatprep.subr.bf16.mxu0 %v938_v12  ;;  %v958_v32 = vld [vmem:[%s241_s14] ss:$16 sps:$4 sm:$0xff]   ;;  %v960_v33 = vld [vmem:[%s241_s14 + $0x4] ss:$16 sps:$4 sm:$0xff]   ;;  %v961_v34 = vld [vmem:[%s241_s14 + $0x8] ss:$16 sps:$4 sm:$0xff]  }
  0x19   : > { %886 = vmatprep.subr.bf16.mxu1 %v939_v13  ;;  %v963_v35 = vld [vmem:[%s241_s14 + $0xc] ss:$16 sps:$4 sm:$0xff]   ;;  %581 = vmatprep.mubr.bf16.mxu0 %v960_v33  ;;  %v809_v41 = vld [vmem:[%s1159_s2] ss:$0 sm:$0xff] }
  0x1a   : > { %622 = vmatprep.mubr.bf16.mxu1 %v963_v35 }
  0x1b   : > { %865 = vmatpush3.bf16.msra.mxu0 %v940_v14 }
  0x1c   : > { %887 = vmatpush3.bf16.msra.mxu1 %v941_v15  ;;  %866 = vmatprep.subr.bf16.mxu0 %v942_v16 }
  0x1d   : > { %888 = vmatprep.subr.bf16.mxu1 %v943_v17 }
  0x1f   : > { %867 = vmatpush3.bf16.msra.mxu0 %v944_v18 }
  0x20   : > { %889 = vmatpush3.bf16.msra.mxu1 %v945_v19  ;;  %868 = vmatprep.subr.bf16.mxu0 %v946_v20 }
  0x21   : > { %890 = vmatprep.subr.bf16.mxu1 %v947_v21 }
  0x23   : > { %869 = vmatpush3.bf16.msra.mxu0 %v948_v22 }
  0x24   : > { %891 = vmatpush3.bf16.msra.mxu1 %v949_v23  ;;  %870 = vmatprep.subr.bf16.mxu0 %v950_v24 }
  0x25   : > { %892 = vmatprep.subr.bf16.mxu1 %v951_v25 }
  0x27   : > { %871 = vmatpush3.bf16.msra.mxu0 %v952_v26 }
  0x28   : > { %893 = vmatpush3.bf16.msra.mxu1 %v953_v27  ;;  %872 = vmatprep.subr.bf16.mxu0 %v954_v28 }
  0x29   : > { %894 = vmatprep.subr.bf16.mxu1 %v955_v29 }
  0x2b   : > { %873 = vmatpush3.bf16.msra.mxu0 %v956_v30 }
  0x2c   : > { %895 = vmatpush3.bf16.msra.mxu1 %v957_v31 }
  0x2e   : > { %582 = vmatmul.mubr.bf16.vlgmr.msra.gmra.mxu0 %v958_v32 }
  0x2f   : > { %623 = vmatmul.mubr.bf16.vlgmr.msra.gmra.mxu1 %v961_v34 }
  0xee   : > { %v874_v36 = vpop.f32.mrf.mxu0 }
  0xef   : > { %v896_v37 = vpop.f32.mrf.mxu1 }
  0xf0   : > { %v875_v38 = vpop.f32.mrf.mxu0 }
  0xf1   : > { %v876_v39 = vadd.f32 %v875_v38, %v874_v36  ;;  %v897_v40 = vpop.f32.mrf.mxu1 }
  0xf2   : > { %v877_v42 = vpop.f32.mrf.mxu0  ;;  %v898_v48 = vadd.f32 %v897_v40, %v896_v37 }
  0xf3   : > { %v899_v43 = vpop.f32.mrf.mxu1  ;;  %v584_v45 = vadd.f32 %v876_v39, %v809_v41 }
  0xf4   : > { %v878_v44 = vpop.f32.mrf.mxu0 }
  0xf5   : > { %v879_v46 = vadd.f32 %v878_v44, %v877_v42  ;;  %v900_v47 = vpop.f32.mrf.mxu1  ;;  %v625_v51 = vadd.f32 %v898_v48, %v584_v45 }
  0xf6   : > { %v901_v50 = vadd.f32 %v900_v47, %v899_v43 }
  0xf7   : > { %v587_v49 = vadd.f32 %v879_v46, %v809_v41 }
  0xf9   : > { %v628_v52 = vadd.f32 %v901_v50, %v587_v49 }
  0xfb   : > { %v631_v53 = vpack.c.bf16 %v628_v52, %v625_v51 }
  0xfd   : > { %857 = vst [vmem:[%s251_s28] sm:$0xff] %v631_v53   ;;  %v641_v54 = vunpack.c.l.bf16 %v631_v53  ;;  %v642_v55 = vunpack.c.h.bf16 %v631_v53 }
  0xff   : > { %v643_v56 = vadd.f32 %v642_v55, %v641_v54  ;;  %v651_v57 = vmul.f32 %v641_v54, %v641_v54  ;;  %v652_v58 = vmul.f32 %v642_v55, %v642_v55 }
 0x101   : > { %v644_v59 = vrot.slane %v643_v56, 4  ;;  %v653_v60 = vadd.f32 %v652_v58, %v651_v57 }
 0x103   : > { %v645_v61 = vadd.f32 %v644_v59, %v643_v56  ;;  %v654_v62 = vrot.slane %v653_v60, 4 }
 0x105   : > { %v646_v63 = vrot.slane %v645_v61, 2  ;;  %v655_v0 = vadd.f32 %v654_v62, %v653_v60 }
 0x107   : > { %v647_v1 = vadd.f32 %v646_v63, %v645_v61  ;;  %v656_v2 = vrot.slane %v655_v0, 2 }
 0x109   : > { %v648_v3 = vrot.slane %v647_v1, 1  ;;  %v657_v4 = vadd.f32 %v656_v2, %v655_v0 }
 0x10b   : > { %v649_v5 = vadd.f32 %v648_v3, %v647_v1  ;;  %v658_v6 = vrot.slane %v657_v4, 1 }
 0x10d   : > { %650 = vst [vmem:[%s260_s6] sm:$0x1] %v649_v5  ;;  %v659_v7 = vadd.f32 %v658_v6, %v657_v4 }
 0x10f   : > { %660 = vst [vmem:[%s260_s6 + $0x1] sm:$0x1] %v659_v7 }
 0x110 PF: > { %s15_s17 = sadd.s32 1, %s986_s17   ;;  %s1162_s15 = smov %s982_s16 }
 0x111   : > { %p12_p6 = scmp.ge.s32.totalorder %s15_s17, 4   ;;  %s1163_s16 = smov %s1165_s18 }
 0x113   :  { %14 = sbr.rel (!%p12_p6) target bundleno = 2 (0x2), region = 74 }

// kernel: squeeze.52
= control target key start
LH: loop header
LB: loop body
LE: loop exit
PB: predicated region body
PF: predicated region fallthrough
CT: control target
= control target key end

     0   :  { %vm3_vm0 = vcmask 130048   ;;  %s115_s0 = inlined_call_operand.vmem [shape: f32[1,18,16], index: 0, kind: input, shape index: {}]   ;;  %s116_s1 = inlined_call_operand.vmem [shape: f32[2,3,3,16], index: 1, kind: output, shape index: {}]  }
   0x1   :  { %v2_v0 = vld [vmem:[%s115_s0] sm:$0xff]   ;;  %v71_v1 = vld [vmem:[%s115_s0 + $0x8] sm:$0xff]   ;;  %v72_v2 = vld [vmem:[%s115_s0 + $0x10] sm:$0x3]  }
   0x2   :  { %4 = vst.msk [vmem:[#allocation0] sm:$0x7] %vm3_vm0, %v2_v0   ;;  %6 = vst.msk [vmem:[#allocation0 + $0x5] sm:$0x38] %vm3_vm0, %v2_v0  }
   0x3   :  { %8 = vst.msk [vmem:[#allocation0 + $0xa] sm:$0xc0] %vm3_vm0, %v2_v0   ;;  %13 = vst.msk [vmem:[#allocation0 + $0x12] ss:$6 sm:$0x3] %vm3_vm0, %v71_v1  }
   0x4   :  { %15 = vst.msk [vmem:[#allocation0 + $0x17] sm:$0xc] %vm3_vm0, %v71_v1   ;;  %17 = vst.msk [vmem:[#allocation0 + $0x1c] sm:$0x70] %vm3_vm0, %v71_v1  }
   0x5   :  { %19 = vst.msk [vmem:[#allocation0 + $0x21] sm:$0x80] %vm3_vm0, %v71_v1   ;;  %24 = vst.msk [vmem:[#allocation0 + $0x29] sm:$0x3] %vm3_vm0, %v72_v2  }
   0x9   :  { %v29_v3 = vld [vmem:[#allocation0] sm:$0xf]  ;;  %v34_v4 = vld [vmem:[#allocation0 + $0x8] sm:$0xf] }
   0xa   :  { %v40_v5 = vld [vmem:[#allocation0 + $0x10] sm:$0xf]  ;;  %32 = vst [vmem:[%s116_s1] sm:$0xf] %v29_v3  ;;  %73 = vst [vmem:[%s116_s1 + $0x4] sm:$0xf] %v34_v4 }
   0xb   :  { %74 = vst [vmem:[%s116_s1 + $0x8] sm:$0xf] %v40_v5  ;;  %v47_v6 = vld [vmem:[#allocation0 + $0x18] sm:$0xf]  ;;  %v54_v7 = vld [vmem:[#allocation0 + $0x20] sm:$0xf] }
   0xc   :  { %v61_v8 = vld [vmem:[#allocation0 + $0x28] sm:$0xf]  ;;  %75 = vst [vmem:[%s116_s1 + $0xc] sm:$0xf] %v47_v6  ;;  %76 = vst [vmem:[%s116_s1 + $0x10] sm:$0xf] %v54_v7 }
   0xd   :  { %77 = vst [vmem:[%s116_s1 + $0x14] sm:$0xf] %v61_v8 }

// kernel: _forward.10
= control target key start
LH: loop header
LB: loop body
LE: loop exit
PB: predicated region body
PF: predicated region fallthrough
CT: control target
= control target key end

     0   :  { %s1481_s15 = smov 0   ;;  %s1483_s16 = smov 0   ;;  %s1731_s0 = inlined_call_operand.vmem [shape: bf16[1,32,1024], index: 0, kind: input, shape index: {}]   ;;  %s1732_s1 = inlined_call_operand.vmem [shape: bf16[1024,128], index: 1, kind: input, shape index: {}]   ;;  %s1733_s2 = inlined_call_operand.vmem [shape: f32[1,128], index: 2, kind: input, shape index: {}]   ;;  %s1734_s3 = inlined_call_operand.vmem [shape: bf16[1,32,128], index: 3, kind: output, shape index: {0}]   ;;  %s1735_s4 = inlined_call_operand.vmem [shape: f32[1,16,128], index: 4, kind: output, shape index: {1}]  }
   0x1   :  { %s1485_s17 = smov 0  }
   0x2 LB: > { %s24_s18 = sadd.s32 1, %s1450_s16  ;;  %p1164_p0 = scmp.ge.s32.totalorder %s1454_s17, 1  ;;  %s1454_s17 = sphi %s1485_s17, %s15_s17   ;;  %s1450_s16 = sphi %s1483_s16, %s1737_s16   ;;  %s1446_s15 = sphi %s1481_s15, %s1736_s15  }
   0x3   : > { %p25_p1 = scmp.ge.s32.totalorder %s24_s18, 2  ;;  %p189_p2 = scmp.lt.s32.totalorder %s1454_s17, 3 }
   0x5   : > { %s1739_s18 = smov (%p25_p1, %s24_s18), 0  ;;  %p190_p3 = pnand %p1164_p0, %p189_p2 }
   0x6   : > { %s1165_s29 = sshll.u32 (!%p190_p3), %s1446_s15, 1  ;;  %p255_p5 = scmp.lt.s32.totalorder (!%p190_p3), %s1446_s15, 1 }
   0x7   : > { %193 = sbr.rel (%p190_p3) target bundleno = 304 (0x130), region = 32  ;;  %p235_p4 = scmp.lt.s32.totalorder (!%p190_p3), %s1165_s29, 3 }
   0xc   : > { %v1368_v0 = vld [vmem:[%s1732_s1 + $0x78] sm:$0xff]   ;;  %v1372_v4 = vld [vmem:[%s1732_s1 + $0x70] sm:$0xff]   ;;  %v1376_v8 = vld [vmem:[%s1732_s1 + $0x68] sm:$0xff]   ;;  %s1741_s29 = smov (!%p235_p4, %s1165_s29), 3  ;;  %s1743_s15 = smov (!%p255_p5, %s1446_s15), 1 }
   0xd   : > { %v1369_v1 = vld [vmem:[%s1732_s1 + $0xf8] sm:$0xff]   ;;  %1256 = vmatprep.subr.bf16.mxu0 %v1368_v0  ;;  %v1373_v5 = vld [vmem:[%s1732_s1 + $0xf0] sm:$0xff]   ;;  %v1377_v9 = vld [vmem:[%s1732_s1 + $0xe8] sm:$0xff]   ;;  %s1248_s5 = sshll.u32 %s1741_s29, 5 }
   0xe   : > { %v1370_v2 = vld [vmem:[%s1732_s1 + $0x38] sm:$0xff]   ;;  %1278 = vmatprep.subr.bf16.mxu1 %v1369_v1  ;;  %v1374_v6 = vld [vmem:[%s1732_s1 + $0x30] sm:$0xff]   ;;  %v1378_v10 = vld [vmem:[%s1732_s1 + $0x28] sm:$0xff]   ;;  %s1598_s14 = scalar_lea.vmem %s1731_s0, %s1248_s5 }
   0xf   : > { %v1371_v3 = vld [vmem:[%s1732_s1 + $0xb8] sm:$0xff]   ;;  %1257 = vmatpush3.bf16.msra.mxu0 %v1370_v2  ;;  %v1375_v7 = vld [vmem:[%s1732_s1 + $0xb0] sm:$0xff]   ;;  %v1379_v11 = vld [vmem:[%s1732_s1 + $0xa8] sm:$0xff]  }
  0x10   : > { %1279 = vmatpush3.bf16.msra.mxu1 %v1371_v3  ;;  %1258 = vmatprep.subr.bf16.mxu0 %v1372_v4  ;;  %v1380_v12 = vld [vmem:[%s1732_s1 + $0x60] sm:$0xff]   ;;  %v1384_v16 = vld [vmem:[%s1732_s1 + $0x58] sm:$0xff]   ;;  %v1388_v20 = vld [vmem:[%s1732_s1 + $0x50] sm:$0xff]  }
  0x11   : > { %1280 = vmatprep.subr.bf16.mxu1 %v1373_v5  ;;  %v1381_v13 = vld [vmem:[%s1732_s1 + $0xe0] sm:$0xff]   ;;  %v1385_v17 = vld [vmem:[%s1732_s1 + $0xd8] sm:$0xff]   ;;  %v1389_v21 = vld [vmem:[%s1732_s1 + $0xd0] sm:$0xff]  }
  0x12   : > { %v1382_v14 = vld [vmem:[%s1732_s1 + $0x20] sm:$0xff]   ;;  %v1386_v18 = vld [vmem:[%s1732_s1 + $0x18] sm:$0xff]   ;;  %v1390_v22 = vld [vmem:[%s1732_s1 + $0x10] sm:$0xff]  }
  0x13   : > { %1259 = vmatpush3.bf16.msra.mxu0 %v1374_v6  ;;  %v1383_v15 = vld [vmem:[%s1732_s1 + $0xa0] sm:$0xff]   ;;  %v1387_v19 = vld [vmem:[%s1732_s1 + $0x98] sm:$0xff]   ;;  %v1391_v23 = vld [vmem:[%s1732_s1 + $0x90] sm:$0xff]  }
  0x14   : > { %1281 = vmatpush3.bf16.msra.mxu1 %v1375_v7  ;;  %1260 = vmatprep.subr.bf16.mxu0 %v1376_v8  ;;  %v1392_v24 = vld [vmem:[%s1732_s1 + $0x48] sm:$0xff]   ;;  %v1396_v28 = vld [vmem:[%s1732_s1 + $0x40] sm:$0xff]   ;;  %v1400_v40 = vld [vmem:[%s1732_s1 + $0x178] sm:$0xff]  }
  0x15   : > { %1282 = vmatprep.subr.bf16.mxu1 %v1377_v9  ;;  %v1393_v25 = vld [vmem:[%s1732_s1 + $0xc8] sm:$0xff]   ;;  %v1397_v29 = vld [vmem:[%s1732_s1 + $0xc0] sm:$0xff]   ;;  %v1401_v41 = vld [vmem:[%s1732_s1 + $0x1f8] sm:$0xff]  }
  0x16   : > { %v1394_v26 = vld [vmem:[%s1732_s1 + $0x8] sm:$0xff]   ;;  %v1398_v30 = vld [vmem:[%s1732_s1] sm:$0xff]   ;;  %v1402_v42 = vld [vmem:[%s1732_s1 + $0x138] sm:$0xff]  }
  0x17   : > { %1261 = vmatpush3.bf16.msra.mxu0 %v1378_v10  ;;  %v1395_v27 = vld [vmem:[%s1732_s1 + $0x88] sm:$0xff]   ;;  %v1399_v31 = vld [vmem:[%s1732_s1 + $0x80] sm:$0xff]   ;;  %v1403_v43 = vld [vmem:[%s1732_s1 + $0x1b8] sm:$0xff]  }
  0x18   : > { %1283 = vmatpush3.bf16.msra.mxu1 %v1379_v11  ;;  %1262 = vmatprep.subr.bf16.mxu0 %v1380_v12  ;;  %v262_v32 = vld [vmem:[%s1598_s14] sm:$0xff]  ;;  %v263_v34 = vld [vmem:[%s1598_s14 + $0x8] sm:$0xff]  ;;  %v1404_v44 = vld [vmem:[%s1732_s1 + $0x170] sm:$0xff]  }
  0x19   : > { %1284 = vmatprep.subr.bf16.mxu1 %v1381_v13  ;;  %v266_v33 = vld [vmem:[%s1598_s14 + $0x20] sm:$0xff]  ;;  %v267_v37 = vld [vmem:[%s1598_s14 + $0x28] sm:$0xff]  ;;  %v1405_v45 = vld [vmem:[%s1732_s1 + $0x1f0] sm:$0xff]  }
  0x1a   : > { %v1172_v35 = vcombine.low %v262_v32, %v266_v33  ;;  %v1173_v36 = vcombine.high %v262_v32, %v266_v33  ;;  %v1174_v38 = vcombine.low %v263_v34, %v267_v37  ;;  %v1175_v39 = vcombine.high %v263_v34, %v267_v37  ;;  %v1406_v46 = vld [vmem:[%s1732_s1 + $0x130] sm:$0xff]   ;;  %v1408_v48 = vld [vmem:[%s1732_s1 + $0x168] sm:$0xff]   ;;  %v1412_v52 = vld [vmem:[%s1732_s1 + $0x160] sm:$0xff]  }
  0x1b   : > { %1263 = vmatpush3.bf16.msra.mxu0 %v1382_v14  ;;  %v1407_v47 = vld [vmem:[%s1732_s1 + $0x1b0] sm:$0xff]   ;;  %v1409_v49 = vld [vmem:[%s1732_s1 + $0x1e8] sm:$0xff]   ;;  %v1413_v53 = vld [vmem:[%s1732_s1 + $0x1e0] sm:$0xff]  }
  0x1c   : > { %1285 = vmatpush3.bf16.msra.mxu1 %v1383_v15  ;;  %1264 = vmatprep.subr.bf16.mxu0 %v1384_v16  ;;  %v1410_v50 = vld [vmem:[%s1732_s1 + $0x128] sm:$0xff]   ;;  %v1414_v54 = vld [vmem:[%s1732_s1 + $0x120] sm:$0xff]   ;;  %v1416_v56 = vld [vmem:[%s1732_s1 + $0x158] sm:$0xff]  }
  0x1d   : > { %1286 = vmatprep.subr.bf16.mxu1 %v1385_v17  ;;  %861 = vmatprep.mubr.bf16.mxu0 %v1173_v36  ;;  %v1411_v51 = vld [vmem:[%s1732_s1 + $0x1a8] sm:$0xff]   ;;  %v1415_v55 = vld [vmem:[%s1732_s1 + $0x1a0] sm:$0xff]   ;;  %v1417_v57 = vld [vmem:[%s1732_s1 + $0x1d8] sm:$0xff]  }
  0x1e   : > { %902 = vmatprep.mubr.bf16.mxu1 %v1175_v39  ;;  %v1418_v58 = vld [vmem:[%s1732_s1 + $0x118] sm:$0xff]   ;;  %v1420_v60 = vld [vmem:[%s1732_s1 + $0x150] sm:$0xff]   ;;  %v1424_v0 = vld [vmem:[%s1732_s1 + $0x148] sm:$0xff]  }
  0x1f   : > { %1265 = vmatpush3.bf16.msra.mxu0 %v1386_v18  ;;  %v1419_v59 = vld [vmem:[%s1732_s1 + $0x198] sm:$0xff]   ;;  %v1421_v61 = vld [vmem:[%s1732_s1 + $0x1d0] sm:$0xff]   ;;  %v1425_v1 = vld [vmem:[%s1732_s1 + $0x1c8] sm:$0xff]  }
  0x20   : > { %1287 = vmatpush3.bf16.msra.mxu1 %v1387_v19  ;;  %1266 = vmatprep.subr.bf16.mxu0 %v1388_v20  ;;  %v1422_v62 = vld [vmem:[%s1732_s1 + $0x110] sm:$0xff]   ;;  %v1426_v2 = vld [vmem:[%s1732_s1 + $0x108] sm:$0xff]   ;;  %v1428_v4 = vld [vmem:[%s1732_s1 + $0x140] sm:$0xff]  }
  0x21   : > { %1288 = vmatprep.subr.bf16.mxu1 %v1389_v21  ;;  %v1423_v63 = vld [vmem:[%s1732_s1 + $0x190] sm:$0xff]   ;;  %v1427_v3 = vld [vmem:[%s1732_s1 + $0x188] sm:$0xff]   ;;  %v1429_v5 = vld [vmem:[%s1732_s1 + $0x1c0] sm:$0xff]  }
  0x22   : > { %v1430_v6 = vld [vmem:[%s1732_s1 + $0x100] sm:$0xff]   ;;  %v264_v8 = vld [vmem:[%s1598_s14 + $0x10] sm:$0xff]  ;;  %v265_v12 = vld [vmem:[%s1598_s14 + $0x18] sm:$0xff] }
  0x23   : > { %1267 = vmatpush3.bf16.msra.mxu0 %v1390_v22  ;;  %v1431_v7 = vld [vmem:[%s1732_s1 + $0x180] sm:$0xff]   ;;  %v268_v9 = vld [vmem:[%s1598_s14 + $0x30] sm:$0xff]  ;;  %v269_v13 = vld [vmem:[%s1598_s14 + $0x38] sm:$0xff]  ;;  %s1169_s14 = sshll.u32 %s1741_s29, 2  ;;  %s1170_s29 = sshll.u32 %s1743_s15, 3 }
  0x24   : > { %1289 = vmatpush3.bf16.msra.mxu1 %v1391_v23  ;;  %1268 = vmatprep.subr.bf16.mxu0 %v1392_v24  ;;  %v1176_v10 = vcombine.low %v264_v8, %v268_v9  ;;  %v1177_v11 = vcombine.high %v264_v8, %v268_v9  ;;  %v1178_v14 = vcombine.low %v265_v12, %v269_v13  ;;  %v1171_v24 = vld [vmem:[%s1733_s2] ss:$0 sm:$0xff]  ;;  %s251_s6 = scalar_lea.vmem %s1734_s3, %s1169_s14  ;;  %s260_s9 = scalar_lea.vmem %s1735_s4, %s1170_s29 }
  0x25   : > { %1290 = vmatprep.subr.bf16.mxu1 %v1393_v25  ;;  %v1179_v15 = vcombine.high %v265_v12, %v269_v13 }
  0x27   : > { %1269 = vmatpush3.bf16.msra.mxu0 %v1394_v26 }
  0x28   : > { %1291 = vmatpush3.bf16.msra.mxu1 %v1395_v27  ;;  %1270 = vmatprep.subr.bf16.mxu0 %v1396_v28 }
  0x29   : > { %1292 = vmatprep.subr.bf16.mxu1 %v1397_v29 }
  0x2b   : > { %1271 = vmatpush3.bf16.msra.mxu0 %v1398_v30 }
  0x2c   : > { %1293 = vmatpush3.bf16.msra.mxu1 %v1399_v31  ;;  %1300 = vmatprep.subr.bf16.mxu0 %v1400_v40 }
  0x2d   : > { %1322 = vmatprep.subr.bf16.mxu1 %v1401_v41 }
  0x2e   : > { %862 = vmatmul.mubr.bf16.vlgmr.msra.gmra.mxu0 %v1172_v35 }
  0x2f   : > { %903 = vmatmul.mubr.bf16.vlgmr.msra.gmra.mxu1 %v1174_v38  ;;  %1301 = vmatpush3.bf16.msra.mxu0 %v1402_v42 }
  0x30   : > { %1323 = vmatpush3.bf16.msra.mxu1 %v1403_v43  ;;  %1302 = vmatprep.subr.bf16.mxu0 %v1404_v44 }
  0x31   : > { %1324 = vmatprep.subr.bf16.mxu1 %v1405_v45  ;;  %943 = vmatprep.mubr.bf16.mxu0 %v1177_v11 }
  0x32   : > { %984 = vmatprep.mubr.bf16.mxu1 %v1179_v15 }
  0x33   : > { %1303 = vmatpush3.bf16.msra.mxu0 %v1406_v46 }
  0x34   : > { %1325 = vmatpush3.bf16.msra.mxu1 %v1407_v47  ;;  %1304 = vmatprep.subr.bf16.mxu0 %v1408_v48 }
  0x35   : > { %1326 = vmatprep.subr.bf16.mxu1 %v1409_v49 }
  0x37   : > { %1305 = vmatpush3.bf16.msra.mxu0 %v1410_v50 }
  0x38   : > { %1327 = vmatpush3.bf16.msra.mxu1 %v1411_v51  ;;  %1306 = vmatprep.subr.bf16.mxu0 %v1412_v52 }
  0x39   : > { %1328 = vmatprep.subr.bf16.mxu1 %v1413_v53 }
  0x3b   : > { %1307 = vmatpush3.bf16.msra.mxu0 %v1414_v54 }
  0x3c   : > { %1329 = vmatpush3.bf16.msra.mxu1 %v1415_v55  ;;  %1308 = vmatprep.subr.bf16.mxu0 %v1416_v56 }
  0x3d   : > { %1330 = vmatprep.subr.bf16.mxu1 %v1417_v57 }
  0x3f   : > { %1309 = vmatpush3.bf16.msra.mxu0 %v1418_v58 }
  0x40   : > { %1331 = vmatpush3.bf16.msra.mxu1 %v1419_v59  ;;  %1310 = vmatprep.subr.bf16.mxu0 %v1420_v60 }
  0x41   : > { %1332 = vmatprep.subr.bf16.mxu1 %v1421_v61 }
  0x43   : > { %1311 = vmatpush3.bf16.msra.mxu0 %v1422_v62 }
  0x44   : > { %1333 = vmatpush3.bf16.msra.mxu1 %v1423_v63  ;;  %1312 = vmatprep.subr.bf16.mxu0 %v1424_v0 }
  0x45   : > { %1334 = vmatprep.subr.bf16.mxu1 %v1425_v1 }
  0x47   : > { %1313 = vmatpush3.bf16.msra.mxu0 %v1426_v2 }
  0x48   : > { %1335 = vmatpush3.bf16.msra.mxu1 %v1427_v3  ;;  %1314 = vmatprep.subr.bf16.mxu0 %v1428_v4 }
  0x49   : > { %1336 = vmatprep.subr.bf16.mxu1 %v1429_v5 }
  0x4b   : > { %1315 = vmatpush3.bf16.msra.mxu0 %v1430_v6 }
  0x4c   : > { %1337 = vmatpush3.bf16.msra.mxu1 %v1431_v7 }
  0x4e   : > { %944 = vmatmul.mubr.bf16.vlgmr.msra.gmra.mxu0 %v1176_v10 }
  0x4f   : > { %985 = vmatmul.mubr.bf16.vlgmr.msra.gmra.mxu1 %v1178_v14 }
  0xee   : > { %v1272_v16 = vpop.f32.mrf.mxu0 }
  0xef   : > { %v1294_v17 = vpop.f32.mrf.mxu1 }
  0xf0   : > { %v1273_v18 = vpop.f32.mrf.mxu0 }
  0xf1   : > { %v1295_v19 = vpop.f32.mrf.mxu1  ;;  %v1274_v23 = vadd.f32 %v1273_v18, %v1272_v16 }
  0xf2   : > { %v1275_v20 = vpop.f32.mrf.mxu0  ;;  %v1296_v29 = vadd.f32 %v1295_v19, %v1294_v17 }
  0xf3   : > { %v1297_v21 = vpop.f32.mrf.mxu1  ;;  %v864_v28 = vadd.f32 %v1274_v23, %v1171_v24 }
  0xf4   : > { %v1276_v22 = vpop.f32.mrf.mxu0 }
  0xf5   : > { %v1277_v25 = vadd.f32 %v1276_v22, %v1275_v20  ;;  %v1298_v26 = vpop.f32.mrf.mxu1  ;;  %v905_v36 = vadd.f32 %v1296_v29, %v864_v28 }
  0xf6   : > { %v1299_v37 = vadd.f32 %v1298_v26, %v1297_v21 }
  0xf7   : > { %v867_v32 = vadd.f32 %v1277_v25, %v1171_v24 }
  0xf9   : > { %v908_v40 = vadd.f32 %v1299_v37, %v867_v32 }
 0x10e   : > { %v1316_v27 = vpop.f32.mrf.mxu0 }
 0x10f   : > { %v1338_v30 = vpop.f32.mrf.mxu1 }
 0x110   : > { %v1317_v31 = vpop.f32.mrf.mxu0 }
 0x111   : > { %v1318_v33 = vadd.f32 %v1317_v31, %v1316_v27  ;;  %v1339_v34 = vpop.f32.mrf.mxu1 }
 0x112   : > { %v1319_v35 = vpop.f32.mrf.mxu0  ;;  %v1340_v44 = vadd.f32 %v1339_v34, %v1338_v30 }
 0x113   : > { %v1341_v38 = vpop.f32.mrf.mxu1  ;;  %v946_v41 = vadd.f32 %v1318_v33, %v905_v36 }
 0x114   : > { %v1320_v39 = vpop.f32.mrf.mxu0 }
 0x115   : > { %v1321_v42 = vadd.f32 %v1320_v39, %v1319_v35  ;;  %v1342_v43 = vpop.f32.mrf.mxu1  ;;  %v987_v47 = vadd.f32 %v1340_v44, %v946_v41 }
 0x116   : > { %v1343_v46 = vadd.f32 %v1342_v43, %v1341_v38 }
 0x117   : > { %v949_v45 = vadd.f32 %v1321_v42, %v908_v40 }
 0x119   : > { %v990_v48 = vadd.f32 %v1343_v46, %v949_v45 }
 0x11b   : > { %v993_v49 = vpack.c.bf16 %v990_v48, %v987_v47 }
 0x11d   : > { %1255 = vst [vmem:[%s251_s6] sm:$0xff] %v993_v49   ;;  %v1003_v50 = vunpack.c.l.bf16 %v993_v49  ;;  %v1004_v51 = vunpack.c.h.bf16 %v993_v49 }
 0x11f   : > { %v1005_v52 = vadd.f32 %v1004_v51, %v1003_v50  ;;  %v1013_v53 = vmul.f32 %v1003_v50, %v1003_v50  ;;  %v1014_v54 = vmul.f32 %v1004_v51, %v1004_v51 }
 0x121   : > { %v1006_v55 = vrot.slane %v1005_v52, 4  ;;  %v1015_v56 = vadd.f32 %v1014_v54, %v1013_v53 }
 0x123   : > { %v1007_v57 = vadd.f32 %v1006_v55, %v1005_v52  ;;  %v1016_v58 = vrot.slane %v1015_v56, 4 }
 0x125   : > { %v1008_v59 = vrot.slane %v1007_v57, 2  ;;  %v1017_v60 = vadd.f32 %v1016_v58, %v1015_v56 }
 0x127   : > { %v1009_v61 = vadd.f32 %v1008_v59, %v1007_v57  ;;  %v1018_v62 = vrot.slane %v1017_v60, 2 }
 0x129   : > { %v1010_v63 = vrot.slane %v1009_v61, 1  ;;  %v1019_v0 = vadd.f32 %v1018_v62, %v1017_v60 }
 0x12b   : > { %v1011_v1 = vadd.f32 %v1010_v63, %v1009_v61  ;;  %v1020_v2 = vrot.slane %v1019_v0, 1 }
 0x12d   : > { %1012 = vst [vmem:[%s260_s9] sm:$0x1] %v1011_v1  ;;  %v1021_v3 = vadd.f32 %v1020_v2, %v1019_v0 }
 0x12f   : > { %1022 = vst [vmem:[%s260_s9 + $0x1] sm:$0x1] %v1021_v3 }
 0x130 PF: > { %s15_s17 = sadd.s32 1, %s1454_s17   ;;  %s1736_s15 = smov %s1450_s16 }
 0x131   : > { %p12_p6 = scmp.ge.s32.totalorder %s15_s17, 4   ;;  %s1737_s16 = smov %s1739_s18 }
 0x133   :  { %14 = sbr.rel (!%p12_p6) target bundleno = 2 (0x2), region = 74 }

// kernel: _forward.11
= control target key start
LH: loop header
LB: loop body
LE: loop exit
PB: predicated region body
PF: predicated region fallthrough
CT: control target
= control target key end

     0   :  { %s551_s12 = smov 0   ;;  %s553_s13 = smov 0   ;;  %s611_s0 = inlined_call_operand.vmem [shape: bf16[1,32,128], index: 0, kind: input, shape index: {}]   ;;  %s612_s1 = inlined_call_operand.vmem [shape: bf16[128,128], index: 1, kind: input, shape index: {}]   ;;  %s613_s2 = inlined_call_operand.vmem [shape: f32[1,128], index: 2, kind: input, shape index: {}]   ;;  %s614_s3 = inlined_call_operand.vmem [shape: f32[1,32,128], index: 3, kind: output, shape index: {}]  }
   0x1   :  { %s555_s14 = smov 0  }
   0x2 LB: > { %s22_s15 = sadd.s32 1, %s523_s13  ;;  %p424_p0 = scmp.ge.s32.totalorder %s527_s14, 1  ;;  %s527_s14 = sphi %s555_s14, %s13_s14   ;;  %s523_s13 = sphi %s553_s13, %s616_s13   ;;  %s519_s12 = sphi %s551_s12, %s615_s12  }
   0x3   : > { %p23_p1 = scmp.ge.s32.totalorder %s22_s15, 2  ;;  %p158_p2 = scmp.lt.s32.totalorder %s527_s14, 3 }
   0x5   : > { %s618_s15 = smov (%p23_p1, %s22_s15), 0  ;;  %p159_p3 = pnand %p424_p0, %p158_p2 }
   0x6   : > { %s425_s20 = sshll.u32 (!%p159_p3), %s519_s12, 1 }
   0x7   : > { %162 = sbr.rel (%p159_p3) target bundleno = 245 (0xf5), region = 32  ;;  %p193_p4 = scmp.lt.s32.totalorder (!%p159_p3), %s425_s20, 3 }
   0xc   : > { %v496_v0 = vld [vmem:[%s612_s1 + $0x38] sm:$0xff]   ;;  %v529_v1 = vmov 0.0   ;;  %v497_v2 = vld [vmem:[%s612_s1 + $0x30] sm:$0xff]   ;;  %vm530_vm0 = vmmov 0   ;;  %s620_s20 = smov (!%p193_p4, %s425_s20), 3  ;;  %v498_v3 = vld [vmem:[%s612_s1 + $0x28] sm:$0xff]  }
   0xd   : > { %450 = vmatprep.subr.bf16.mxu0 %v529_v1  ;;  %466 = vmatprep.mubr.msk.bf16.mxu0 %vm530_vm0, %v529_v1  ;;  %s426_s23 = sshll.u32 %s620_s20, 2  ;;  %v499_v4 = vld [vmem:[%s612_s1 + $0x20] sm:$0xff]   ;;  %v500_v5 = vld [vmem:[%s612_s1 + $0x18] sm:$0xff]   ;;  %v501_v6 = vld [vmem:[%s612_s1 + $0x10] sm:$0xff]   ;;  %s428_s10 = sshll.u32 %s620_s20, 3 }
   0xe   : > { %451 = vmatpush3.bf16.msra.mxu0 %v496_v0  ;;  %s198_s26 = scalar_lea.vmem %s611_s0, %s426_s23  ;;  %v502_v7 = vld [vmem:[%s612_s1 + $0x8] sm:$0xff]   ;;  %v503_v8 = vld [vmem:[%s612_s1] sm:$0xff]   ;;  %s208_s18 = scalar_lea.vmem %s614_s3, %s428_s10 }
   0xf   : > { %452 = vmatprep.subr.bf16.mxu0 %v529_v1  ;;  %v504_v9 = vld [vmem:[%s198_s26] sm:$0xff]  }
  0x10   : > { %v429_v10 = vld [vmem:[%s613_s2] ss:$0 sm:$0xff] }
  0x12   : > { %453 = vmatpush3.bf16.msra.mxu0 %v497_v2 }
  0x13   : > { %454 = vmatprep.subr.bf16.mxu0 %v529_v1 }
  0x16   : > { %455 = vmatpush3.bf16.msra.mxu0 %v498_v3 }
  0x17   : > { %456 = vmatprep.subr.bf16.mxu0 %v529_v1 }
  0x1a   : > { %457 = vmatpush3.bf16.msra.mxu0 %v499_v4 }
  0x1b   : > { %458 = vmatprep.subr.bf16.mxu0 %v529_v1 }
  0x1e   : > { %459 = vmatpush3.bf16.msra.mxu0 %v500_v5 }
  0x1f   : > { %460 = vmatprep.subr.bf16.mxu0 %v529_v1 }
  0x22   : > { %461 = vmatpush3.bf16.msra.mxu0 %v501_v6 }
  0x23   : > { %462 = vmatprep.subr.bf16.mxu0 %v529_v1 }
  0x26   : > { %463 = vmatpush3.bf16.msra.mxu0 %v502_v7 }
  0x27   : > { %464 = vmatprep.subr.bf16.mxu0 %v529_v1 }
  0x2a   : > { %465 = vmatpush3.bf16.msra.mxu0 %v503_v8 }
  0x2d   : > { %467 = vmatmul.mubr.bf16.vlgmr.msra.gmra.mxu0 %v504_v9 }
  0xed   : > { %v324_v11 = vpop.f32.mrf.mxu0 }
  0xee   : > { %v325_v12 = vadd.f32 %v429_v10, %v324_v11 }
  0xef   : > { %v468_v13 = vpop.f32.mrf.mxu0 }
  0xf0   : > { %331 = vst [vmem:[%s208_s18] sm:$0xff] %v325_v12 }
  0xf1   : > { %v327_v14 = vpop.f32.mrf.mxu0 }
  0xf2   : > { %v328_v15 = vadd.f32 %v429_v10, %v327_v14 }
  0xf3   : > { %v469_v16 = vpop.f32.mrf.mxu0 }
  0xf4   : > { %332 = vst [vmem:[%s208_s18 + $0x8] sm:$0xff] %v328_v15 }
  0xf5 PF: > { %s13_s14 = sadd.s32 1, %s527_s14   ;;  %s615_s12 = smov %s523_s13 }
  0xf6   : > { %p10_p5 = scmp.ge.s32.totalorder %s13_s14, 4   ;;  %s616_s13 = smov %s618_s15 }
  0xf8   :  { %12 = sbr.rel (!%p10_p5) target bundleno = 2 (0x2), region = 62 }

</bundles_post_ra>
